<compile_context>
chip_gen: v7x
topology: tpu7x:2x2x1
jax: 0.10.0
libtpu: 0.0.40
codegen_flags: <defaults>
</compile_context>

<pallas_src>
import functools

import jax
import jax.numpy as jnp
from jax.experimental import pallas as pl
from jax.experimental.pallas import tpu as pltpu

LN_EPS = 1e-5


def _gelu(z):
    # tanh-approx GELU (BERT-style custom GELU class)
    return 0.5 * z * (1.0 + jnp.tanh(0.7978845608028654 * (z + 0.044715 * z * z * z)))


def _layernorm(t, gamma, beta):
    mu = jnp.mean(t, axis=-1, keepdims=True)
    var = jnp.mean((t - mu) ** 2, axis=-1, keepdims=True)
    return (t - mu) * jax.lax.rsqrt(var + LN_EPS) * gamma + beta


def _round_up(n, m):
    return ((n + m - 1) // m) * m


# ---------------------------------------------------------------------------
# Fused kernel: M attention heads + final MLP (+ optional residual) per row tile.
#   per head m:
#     xn = LN(x); yn = LN(y)                               (VPU/XLU)
#     x_lin = xn @ W1_m + b1_m ; y_lin = yn @ W1_m + b1_m  (MXU, y as [TN*K,H])
#     logit = <x_lin, w2x_m> + <y_lin, w2y_m> + b2_m       (VPU lane reduce, [TN,K])
#     prob  = softmax_K(logit)                             (EUP exp + approx recip)
#     head  = GELU(x + sum_K prob * y_lin)                 (VPU/EUP)
#     acc  += head @ mlp_w_m                               (MXU)
#   out = GELU(acc + mlp_b) (+ x)
# ---------------------------------------------------------------------------
def fused_mha_kernel(x_ref, y_ref, gamma_ref, beta_ref, w1_ref, b1_ref,
                     w2x_ref, w2y_ref, b2_ref, mlpw_ref, mlpb_ref, out_ref,
                     *, num_heads, has_residual, matmul_dtype):
    x = x_ref[...].astype(jnp.float32)                      # [TN, H]
    y = y_ref[...].astype(jnp.float32)                      # [TN, K, H]
    TN, K, H = y.shape
    y2d = y.reshape(TN * K, H)

    gammas = gamma_ref[...]                                  # [M, H]
    betas = beta_ref[...]                                    # [M, H]
    w1s = w1_ref[...]                                        # [M, H, H]
    b1s = b1_ref[...]                                        # [M, H]
    w2xs = w2x_ref[...]                                      # [M, H]
    w2ys = w2y_ref[...]                                      # [M, H]
    b2s = b2_ref[...]                                        # [M, 1]
    mlpws = mlpw_ref[...]                                    # [M, H, H]
    mlpb = mlpb_ref[...]                                     # [1, H]

    if matmul_dtype is None:
        cast = lambda t: t
    else:
        cast = lambda t: t.astype(matmul_dtype)

    acc = jnp.zeros((TN, H), jnp.float32)
    for m in range(num_heads):                               # M is small & static: unrolled
        gamma = gammas[m][None, :]                           # [1, H]
        beta = betas[m][None, :]
        w1 = w1s[m]                                          # [H, H]
        b1 = b1s[m][None, :]
        w2x = w2xs[m][None, :]                               # [1, H]
        w2y = w2ys[m][None, None, :]                         # [1, 1, H]
        b2 = b2s[m, 0]

        # linear1 (Dropout -> LayerNorm -> Linear -> Dropout); dropouts identity.
        xn = _layernorm(x, gamma, beta)
        yn = _layernorm(y2d, gamma, beta)
        x_lin = jnp.dot(cast(xn), cast(w1),
                        preferred_element_type=jnp.float32) + b1              # [TN, H]
        y_lin2d = jnp.dot(cast(yn), cast(w1),
                          preferred_element_type=jnp.float32) + b1            # [TN*K, H]
        y_lin = y_lin2d.reshape(TN, K, H)

        # linear2 on concat([x_lin repeated K, y_lin], -1) == <x_lin,w2x> + <y_lin,w2y> + b2
        # computed on the VPU as broadcast-multiply + lane reduce (no 1-column matmul).
        lx = jnp.sum(x_lin * w2x, axis=-1, keepdims=True)                      # [TN, 1]
        ly = jnp.sum(y_lin * w2y, axis=-1)                                     # [TN, K]
        logit = lx + ly + b2                                                   # [TN, K]

        # softmax over K on lane-dense [TN, K]
        mmax = jnp.max(logit, axis=-1, keepdims=True)
        e = jnp.exp(logit - mmax)
        prob = e * pl.reciprocal(jnp.sum(e, axis=-1, keepdims=True), approx=True)

        a = jnp.sum(y_lin * prob[:, :, None], axis=1)                          # [TN, H]
        head = _gelu(x + a)                                                    # [TN, H]

        # final MLP as a sum over heads: cat @ mlp_w == sum_m head_m @ mlp_w[m]
        acc = acc + jnp.dot(cast(head), cast(mlpws[m]),
                            preferred_element_type=jnp.float32)

    g = _gelu(acc + mlpb)
    if has_residual:
        g = x + g
    out_ref[...] = g.astype(out_ref.dtype)


# ---------------------------------------------------------------------------
# Wrapper: stacks per-head params, pads rows to the tile, single pallas_call.
# ---------------------------------------------------------------------------
def multi_head_attn(x, y, select_indegree_num, params, *, has_residual=True,
                    tile_rows=256, matmul_dtype=None, vmem_limit_bytes=None):
    B, S, H = x.shape
    N = B * S
    K = select_indegree_num
    M = len(params['layers'])
    assert y.shape == (N, K, H)

    x2d = x.reshape(N, H)

    # Stack per-head params so one pallas_call sees all heads (weights DMA'd once).
    layers = params['layers']
    gamma = jnp.stack([p['gamma'].reshape(H) for p in layers])        # [M, H]
    beta = jnp.stack([p['beta'].reshape(H) for p in layers])          # [M, H]
    w1 = jnp.stack([p['w1'] for p in layers])                         # [M, H, H]
    b1 = jnp.stack([p['b1'].reshape(H) for p in layers])              # [M, H]
    w2x = jnp.stack([p['w2x'].reshape(H) for p in layers])            # [M, H]
    w2y = jnp.stack([p['w2y'].reshape(H) for p in layers])            # [M, H]
    b2 = jnp.stack([p['b2'].reshape(1) for p in layers])              # [M, 1]
    mlp_w = params['mlp_w'].reshape(M, H, H)                          # [M, H, H]
    mlp_b = params['mlp_b'].reshape(1, H)                             # [1, H]

    # Row tile: as big as reasonable, multiple of 8 (sublane), pad the tail.
    tn = min(tile_rows, _round_up(N, 8))
    n_pad = _round_up(N, tn)
    if n_pad != N:
        x2d = jnp.pad(x2d, ((0, n_pad - N), (0, 0)))
        y = jnp.pad(y, ((0, n_pad - N), (0, 0), (0, 0)))

    full2 = lambda i: (0, 0)
    full3 = lambda i: (0, 0, 0)

    kernel = functools.partial(fused_mha_kernel, num_heads=M,
                               has_residual=has_residual,
                               matmul_dtype=matmul_dtype)

    out2d = pl.pallas_call(
        kernel,
        out_shape=jax.ShapeDtypeStruct((n_pad, H), x.dtype),
        grid=(n_pad // tn,),
        in_specs=[
            pl.BlockSpec((tn, H), lambda i: (i, 0)),          # x rows
            pl.BlockSpec((tn, K, H), lambda i: (i, 0, 0)),    # y rows
            pl.BlockSpec((M, H), full2),                      # gamma
            pl.BlockSpec((M, H), full2),                      # beta
            pl.BlockSpec((M, H, H), full3),                   # w1
            pl.BlockSpec((M, H), full2),                      # b1
            pl.BlockSpec((M, H), full2),                      # w2 (x half)
            pl.BlockSpec((M, H), full2),                      # w2 (y half)
            pl.BlockSpec((M, 1), full2),                      # b2
            pl.BlockSpec((M, H, H), full3),                   # mlp_w (per-head slabs)
            pl.BlockSpec((1, H), full2),                      # mlp_b
        ],
        out_specs=pl.BlockSpec((tn, H), lambda i: (i, 0)),
        compiler_params=pltpu.CompilerParams(
            dimension_semantics=("parallel",),
            vmem_limit_bytes=vmem_limit_bytes),
    )(x2d, y, gamma, beta, w1, b1, w2x, w2y, b2, mlp_w, mlp_b)

    return out2d[:N].reshape(B, S, H)


# ---------------------------------------------------------------------------
# Deterministic parameter init (matches module shapes; nn.LayerNorm default init)
# ---------------------------------------------------------------------------
def init_params(key, H, num_heads):
    keys = jax.random.split(key, 4 * num_heads + 2)
    layers = []
    for i in range(num_heads):
        k1, k2, k3, k4 = keys[4 * i:4 * i + 4]
        w1 = 0.02 * jax.random.normal(k1, (H, H), jnp.float32)
        b1 = 0.02 * jax.random.normal(k2, (1, H), jnp.float32)
        w2 = 0.02 * jax.random.normal(k3, (2 * H, 1), jnp.float32)
        b2 = 0.02 * jax.random.normal(k4, (1, 1), jnp.float32)
        layers.append(dict(gamma=jnp.ones((1, H), jnp.float32),
                           beta=jnp.zeros((1, H), jnp.float32),
                           w1=w1, b1=b1, w2x=w2[:H], w2y=w2[H:], b2=b2))
    mlp_w = 0.02 * jax.random.normal(keys[-2], (H * num_heads, H), jnp.float32)
    mlp_b = 0.02 * jax.random.normal(keys[-1], (1, H), jnp.float32)
    return dict(layers=layers, mlp_w=mlp_w, mlp_b=mlp_b)


# Pure-JAX reference for correctness checking (eval-mode forward of the module)
def reference(x, y, params, has_residual):
    B, S, H = x.shape
    x2d = x.reshape(B * S, H)
    outs = []
    for p in params['layers']:
        xn = _layernorm(x2d, p['gamma'], p['beta'])
        x_lin = xn @ p['w1'] + p['b1']
        yn = _layernorm(y, p['gamma'], p['beta'])
        y_lin = jnp.einsum('nkh,hd->nkd', yn, p['w1']) + p['b1']
        logit = (x_lin @ p['w2x'])[:, None, :] + jnp.einsum('nkh,ho->nko', y_lin, p['w2y']) + p['b2']
        prob = jax.nn.softmax(logit, axis=1)
        a = jnp.sum(y_lin * prob, axis=1)
        outs.append(_gelu(x2d + a))
    cat = jnp.concatenate(outs, axis=-1)
    res = _gelu(cat @ params['mlp_w'] + params['mlp_b'])
    if has_residual:
        res = x2d + res
    return res.reshape(B, S, H)


if __name__ == "__main__":
    # Small shapes consistent with the forward:  x [B,S,H], y [B*S,K,H]
    B, S, H, K, M = 2, 8, 32, 4, 2
    key = jax.random.PRNGKey(0)
    kx, ky, kp = jax.random.split(key, 3)
    x = jax.random.normal(kx, (B, S, H), jnp.float32)
    y = jax.random.normal(ky, (B * S, K, H), jnp.float32)
    params = init_params(kp, H, M)

    ref = reference(x, y, params, True)

    # f32 MXU path (tight check; approx reciprocal contributes ~1e-4-level error)
    out = multi_head_attn(x, y, K, params, has_residual=True)
    out = jax.block_until_ready(out)
    assert out.shape == (B, S, H)
    assert jnp.allclose(out, ref, atol=1e-3, rtol=1e-3), float(jnp.max(jnp.abs(out - ref)))

    # bf16 MXU-operand path (production setting on v6e/v7x; f32 accumulation kept)
    out_bf16 = multi_head_attn(x, y, K, params, has_residual=True,
                               matmul_dtype=jnp.bfloat16)
    out_bf16 = jax.block_until_ready(out_bf16)
    assert jnp.allclose(out_bf16, ref, atol=3e-2, rtol=3e-2), \
        float(jnp.max(jnp.abs(out_bf16 - ref)))

    # TODO(synk): training-mode dropout (random masks) intentionally omitted; forward is eval-mode.
    # TODO(synk): if production H < 128, consider padding H to 128 with LayerNorm masking for
    #             lane-dense stores; here H is left as-is to keep exact module semantics.
    print("KERNEL_OK")
</pallas_src>

<mosaic_0001>
module attributes {stable_mosaic.version = 11 : i64} {
  func.func @fused_mha_kernel(%arg0: i32, %arg1: memref<16x32xf32, #tpu.memory_space<vmem>>, %arg2: memref<16x4x32xf32, #tpu.memory_space<vmem>>, %arg3: memref<2x32xf32, #tpu.memory_space<vmem>>, %arg4: memref<2x32xf32, #tpu.memory_space<vmem>>, %arg5: memref<2x32x32xf32, #tpu.memory_space<vmem>>, %arg6: memref<2x32xf32, #tpu.memory_space<vmem>>, %arg7: memref<2x32xf32, #tpu.memory_space<vmem>>, %arg8: memref<2x32xf32, #tpu.memory_space<vmem>>, %arg9: memref<2x1xf32, #tpu.memory_space<vmem>>, %arg10: memref<2x32x32xf32, #tpu.memory_space<vmem>>, %arg11: memref<1x32xf32, #tpu.memory_space<vmem>>, %arg12: memref<16x32xf32, #tpu.memory_space<vmem>>) attributes {dimension_semantics = [#tpu.dimension_semantics<parallel>], iteration_bounds = array<i64: 1>, scalar_prefetch = 0 : i64, scratch_operands = 0 : i64, tpu.core_type = #tpu.core_type<tc>, window_params = [{transform_indices = @transform_0, window_bounds = array<i64: 16, 32>}, {transform_indices = @transform_1, window_bounds = array<i64: 16, 4, 32>}, {pipeline_mode = #tpu.pipeline_mode<synchronous>, transform_indices = @transform_2, window_bounds = array<i64: 2, 32>}, {pipeline_mode = #tpu.pipeline_mode<synchronous>, transform_indices = @transform_3, window_bounds = array<i64: 2, 32>}, {pipeline_mode = #tpu.pipeline_mode<synchronous>, transform_indices = @transform_4, window_bounds = array<i64: 2, 32, 32>}, {pipeline_mode = #tpu.pipeline_mode<synchronous>, transform_indices = @transform_5, window_bounds = array<i64: 2, 32>}, {pipeline_mode = #tpu.pipeline_mode<synchronous>, transform_indices = @transform_6, window_bounds = array<i64: 2, 32>}, {pipeline_mode = #tpu.pipeline_mode<synchronous>, transform_indices = @transform_7, window_bounds = array<i64: 2, 32>}, {pipeline_mode = #tpu.pipeline_mode<synchronous>, transform_indices = @transform_8, window_bounds = array<i64: 2, 1>}, {pipeline_mode = #tpu.pipeline_mode<synchronous>, transform_indices = @transform_9, window_bounds = array<i64: 2, 32, 32>}, {pipeline_mode = #tpu.pipeline_mode<synchronous>, transform_indices = @transform_10, window_bounds = array<i64: 1, 32>}, {transform_indices = @transform_11, window_bounds = array<i64: 16, 32>}]} {
    %c0 = arith.constant 0 : index
    %c0_0 = arith.constant 0 : index
    %0 = vector.load %arg1[%c0, %c0_0] : memref<16x32xf32, #tpu.memory_space<vmem>>, vector<16x32xf32>
    %c0_1 = arith.constant 0 : index
    %c0_2 = arith.constant 0 : index
    %c0_3 = arith.constant 0 : index
    %1 = vector.load %arg2[%c0_1, %c0_2, %c0_3] : memref<16x4x32xf32, #tpu.memory_space<vmem>>, vector<16x4x32xf32>
    %2 = vector.shape_cast %1 : vector<16x4x32xf32> to vector<64x32xf32>
    %c0_4 = arith.constant 0 : index
    %c0_5 = arith.constant 0 : index
    %3 = vector.load %arg3[%c0_4, %c0_5] : memref<2x32xf32, #tpu.memory_space<vmem>>, vector<2x32xf32>
    %c0_6 = arith.constant 0 : index
    %c0_7 = arith.constant 0 : index
    %4 = vector.load %arg4[%c0_6, %c0_7] : memref<2x32xf32, #tpu.memory_space<vmem>>, vector<2x32xf32>
    %c0_8 = arith.constant 0 : index
    %c0_9 = arith.constant 0 : index
    %c0_10 = arith.constant 0 : index
    %5 = vector.load %arg5[%c0_8, %c0_9, %c0_10] : memref<2x32x32xf32, #tpu.memory_space<vmem>>, vector<2x32x32xf32>
    %c0_11 = arith.constant 0 : index
    %c0_12 = arith.constant 0 : index
    %6 = vector.load %arg6[%c0_11, %c0_12] : memref<2x32xf32, #tpu.memory_space<vmem>>, vector<2x32xf32>
    %c0_13 = arith.constant 0 : index
    %c0_14 = arith.constant 0 : index
    %7 = vector.load %arg7[%c0_13, %c0_14] : memref<2x32xf32, #tpu.memory_space<vmem>>, vector<2x32xf32>
    %c0_15 = arith.constant 0 : index
    %c0_16 = arith.constant 0 : index
    %8 = vector.load %arg8[%c0_15, %c0_16] : memref<2x32xf32, #tpu.memory_space<vmem>>, vector<2x32xf32>
    %c0_17 = arith.constant 0 : index
    %c0_18 = arith.constant 0 : index
    %9 = vector.load %arg9[%c0_17, %c0_18] : memref<2x1xf32, #tpu.memory_space<vmem>>, vector<2x1xf32>
    %c0_19 = arith.constant 0 : index
    %c0_20 = arith.constant 0 : index
    %c0_21 = arith.constant 0 : index
    %10 = vector.load %arg10[%c0_19, %c0_20, %c0_21] : memref<2x32x32xf32, #tpu.memory_space<vmem>>, vector<2x32x32xf32>
    %c0_22 = arith.constant 0 : index
    %c0_23 = arith.constant 0 : index
    %11 = vector.load %arg11[%c0_22, %c0_23] : memref<1x32xf32, #tpu.memory_space<vmem>>, vector<1x32xf32>
    %cst = arith.constant 0.000000e+00 : f32
    %12 = vector.broadcast %cst : f32 to vector<16x32xf32>
    %13 = vector.extract_strided_slice %3 {offsets = [0, 0], sizes = [1, 32], strides = [1, 1]} : vector<2x32xf32> to vector<1x32xf32>
    %14 = vector.shape_cast %13 : vector<1x32xf32> to vector<32xf32>
    %15 = vector.shape_cast %14 : vector<32xf32> to vector<1x32xf32>
    %16 = vector.extract_strided_slice %4 {offsets = [0, 0], sizes = [1, 32], strides = [1, 1]} : vector<2x32xf32> to vector<1x32xf32>
    %17 = vector.shape_cast %16 : vector<1x32xf32> to vector<32xf32>
    %18 = vector.shape_cast %17 : vector<32xf32> to vector<1x32xf32>
    %19 = vector.extract_strided_slice %5 {offsets = [0, 0, 0], sizes = [1, 32, 32], strides = [1, 1, 1]} : vector<2x32x32xf32> to vector<1x32x32xf32>
    %20 = vector.shape_cast %19 : vector<1x32x32xf32> to vector<32x32xf32>
    %21 = vector.extract_strided_slice %6 {offsets = [0, 0], sizes = [1, 32], strides = [1, 1]} : vector<2x32xf32> to vector<1x32xf32>
    %22 = vector.shape_cast %21 : vector<1x32xf32> to vector<32xf32>
    %23 = vector.shape_cast %22 : vector<32xf32> to vector<1x32xf32>
    %24 = vector.extract_strided_slice %7 {offsets = [0, 0], sizes = [1, 32], strides = [1, 1]} : vector<2x32xf32> to vector<1x32xf32>
    %25 = vector.shape_cast %24 : vector<1x32xf32> to vector<32xf32>
    %26 = vector.shape_cast %25 : vector<32xf32> to vector<1x32xf32>
    %27 = vector.extract_strided_slice %8 {offsets = [0, 0], sizes = [1, 32], strides = [1, 1]} : vector<2x32xf32> to vector<1x32xf32>
    %28 = vector.shape_cast %27 : vector<1x32xf32> to vector<32xf32>
    %29 = vector.shape_cast %28 : vector<32xf32> to vector<1x1x32xf32>
    %30 = vector.extract_strided_slice %9 {offsets = [0, 0], sizes = [1, 1], strides = [1, 1]} : vector<2x1xf32> to vector<1x1xf32>
    %31 = vector.extract %30[0, 0] : f32 from vector<1x1xf32>
    %cst_24 = arith.constant dense<0.000000e+00> : vector<16xf32>
    %32 = vector.multi_reduction <add>, %0, %cst_24 [1] : vector<16x32xf32> to vector<16xf32>
    %33 = vector.shape_cast %32 : vector<16xf32> to vector<16x1xf32>
    %cst_25 = arith.constant 3.200000e+01 : f32
    %34 = vector.broadcast %cst_25 : f32 to vector<16x1xf32>
    %35 = arith.divf %33, %34 : vector<16x1xf32>
    %36 = vector.broadcast %35 : vector<16x1xf32> to vector<16x32xf32>
    %37 = arith.subf %0, %36 : vector<16x32xf32>
    %38 = arith.mulf %37, %37 : vector<16x32xf32>
    %cst_26 = arith.constant dense<0.000000e+00> : vector<16xf32>
    %39 = vector.multi_reduction <add>, %38, %cst_26 [1] : vector<16x32xf32> to vector<16xf32>
    %40 = vector.shape_cast %39 : vector<16xf32> to vector<16x1xf32>
    %cst_27 = arith.constant 3.200000e+01 : f32
    %41 = vector.broadcast %cst_27 : f32 to vector<16x1xf32>
    %42 = arith.divf %40, %41 : vector<16x1xf32>
    %43 = vector.broadcast %35 : vector<16x1xf32> to vector<16x32xf32>
    %44 = arith.subf %0, %43 : vector<16x32xf32>
    %cst_28 = arith.constant 9.99999974E-6 : f32
    %45 = vector.broadcast %cst_28 : f32 to vector<16x1xf32>
    %46 = arith.addf %42, %45 : vector<16x1xf32>
    %47 = math.rsqrt %46 : vector<16x1xf32>
    %48 = vector.broadcast %47 : vector<16x1xf32> to vector<16x32xf32>
    %49 = arith.mulf %44, %48 : vector<16x32xf32>
    %50 = vector.broadcast %15 : vector<1x32xf32> to vector<16x32xf32>
    %51 = arith.mulf %49, %50 : vector<16x32xf32>
    %52 = vector.broadcast %18 : vector<1x32xf32> to vector<16x32xf32>
    %53 = arith.addf %51, %52 : vector<16x32xf32>
    %cst_29 = arith.constant dense<0.000000e+00> : vector<64xf32>
    %54 = vector.multi_reduction <add>, %2, %cst_29 [1] : vector<64x32xf32> to vector<64xf32>
    %55 = vector.shape_cast %54 : vector<64xf32> to vector<64x1xf32>
    %cst_30 = arith.constant 3.200000e+01 : f32
    %56 = vector.broadcast %cst_30 : f32 to vector<64x1xf32>
    %57 = arith.divf %55, %56 : vector<64x1xf32>
    %58 = vector.broadcast %57 : vector<64x1xf32> to vector<64x32xf32>
    %59 = arith.subf %2, %58 : vector<64x32xf32>
    %60 = arith.mulf %59, %59 : vector<64x32xf32>
    %cst_31 = arith.constant dense<0.000000e+00> : vector<64xf32>
    %61 = vector.multi_reduction <add>, %60, %cst_31 [1] : vector<64x32xf32> to vector<64xf32>
    %62 = vector.shape_cast %61 : vector<64xf32> to vector<64x1xf32>
    %cst_32 = arith.constant 3.200000e+01 : f32
    %63 = vector.broadcast %cst_32 : f32 to vector<64x1xf32>
    %64 = arith.divf %62, %63 : vector<64x1xf32>
    %65 = vector.broadcast %57 : vector<64x1xf32> to vector<64x32xf32>
    %66 = arith.subf %2, %65 : vector<64x32xf32>
    %cst_33 = arith.constant 9.99999974E-6 : f32
    %67 = vector.broadcast %cst_33 : f32 to vector<64x1xf32>
    %68 = arith.addf %64, %67 : vector<64x1xf32>
    %69 = math.rsqrt %68 : vector<64x1xf32>
    %70 = vector.broadcast %69 : vector<64x1xf32> to vector<64x32xf32>
    %71 = arith.mulf %66, %70 : vector<64x32xf32>
    %72 = vector.broadcast %15 : vector<1x32xf32> to vector<64x32xf32>
    %73 = arith.mulf %71, %72 : vector<64x32xf32>
    %74 = vector.broadcast %18 : vector<1x32xf32> to vector<64x32xf32>
    %75 = arith.addf %73, %74 : vector<64x32xf32>
    %cst_34 = arith.constant dense<0.000000e+00> : vector<16x32xf32>
    %76 = tpu.matmul %53, %20, %cst_34 {dimension_numbers = #tpu.dot_dimension_numbers<[1], [0], [0], [1], [0, 0, 1, 1], [], []>} : vector<16x32xf32>, vector<32x32xf32>, vector<16x32xf32> -> vector<16x32xf32>
    %77 = vector.broadcast %23 : vector<1x32xf32> to vector<16x32xf32>
    %78 = arith.addf %76, %77 : vector<16x32xf32>
    %cst_35 = arith.constant dense<0.000000e+00> : vector<64x32xf32>
    %79 = tpu.matmul %75, %20, %cst_35 {dimension_numbers = #tpu.dot_dimension_numbers<[1], [0], [0], [1], [0, 0, 1, 1], [], []>} : vector<64x32xf32>, vector<32x32xf32>, vector<64x32xf32> -> vector<64x32xf32>
    %80 = vector.broadcast %23 : vector<1x32xf32> to vector<64x32xf32>
    %81 = arith.addf %79, %80 : vector<64x32xf32>
    %82 = vector.shape_cast %81 : vector<64x32xf32> to vector<16x4x32xf32>
    %83 = vector.broadcast %26 : vector<1x32xf32> to vector<16x32xf32>
    %84 = arith.mulf %78, %83 : vector<16x32xf32>
    %cst_36 = arith.constant dense<0.000000e+00> : vector<16xf32>
    %85 = vector.multi_reduction <add>, %84, %cst_36 [1] : vector<16x32xf32> to vector<16xf32>
    %86 = vector.shape_cast %85 : vector<16xf32> to vector<16x1xf32>
    %87 = vector.broadcast %29 : vector<1x1x32xf32> to vector<16x4x32xf32>
    %88 = arith.mulf %82, %87 : vector<16x4x32xf32>
    %cst_37 = arith.constant dense<0.000000e+00> : vector<16x4xf32>
    %89 = vector.multi_reduction <add>, %88, %cst_37 [2] : vector<16x4x32xf32> to vector<16x4xf32>
    %90 = vector.broadcast %86 : vector<16x1xf32> to vector<16x4xf32>
    %91 = arith.addf %90, %89 : vector<16x4xf32>
    %92 = vector.broadcast %31 : f32 to vector<16x4xf32>
    %93 = arith.addf %91, %92 : vector<16x4xf32>
    %cst_38 = arith.constant dense<0xFF800000> : vector<16xf32>
    %94 = vector.multi_reduction <maximumf>, %93, %cst_38 [1] : vector<16x4xf32> to vector<16xf32>
    %95 = vector.shape_cast %94 : vector<16xf32> to vector<16x1xf32>
    %96 = vector.broadcast %95 : vector<16x1xf32> to vector<16x4xf32>
    %97 = arith.subf %93, %96 : vector<16x4xf32>
    %98 = math.exp %97 : vector<16x4xf32>
    %cst_39 = arith.constant dense<0.000000e+00> : vector<16xf32>
    %99 = vector.multi_reduction <add>, %98, %cst_39 [1] : vector<16x4xf32> to vector<16xf32>
    %100 = vector.shape_cast %99 : vector<16xf32> to vector<16x1xf32>
    %101 = tpu.reciprocal %100 {approx = true} : vector<16x1xf32> -> vector<16x1xf32>
    %102 = vector.broadcast %101 : vector<16x1xf32> to vector<16x4xf32>
    %103 = arith.mulf %98, %102 : vector<16x4xf32>
    %104 = vector.shape_cast %103 : vector<16x4xf32> to vector<16x4x1xf32>
    %105 = vector.broadcast %104 : vector<16x4x1xf32> to vector<16x4x32xf32>
    %106 = arith.mulf %82, %105 : vector<16x4x32xf32>
    %cst_40 = arith.constant dense<0.000000e+00> : vector<16x32xf32>
    %107 = vector.multi_reduction <add>, %106, %cst_40 [1] : vector<16x4x32xf32> to vector<16x32xf32>
    %108 = arith.addf %0, %107 : vector<16x32xf32>
    %cst_41 = arith.constant 5.000000e-01 : f32
    %109 = vector.broadcast %cst_41 : f32 to vector<16x32xf32>
    %110 = arith.mulf %109, %108 : vector<16x32xf32>
    %cst_42 = arith.constant 4.471500e-02 : f32
    %111 = vector.broadcast %cst_42 : f32 to vector<16x32xf32>
    %112 = arith.mulf %111, %108 : vector<16x32xf32>
    %113 = arith.mulf %112, %108 : vector<16x32xf32>
    %114 = arith.mulf %113, %108 : vector<16x32xf32>
    %115 = arith.addf %108, %114 : vector<16x32xf32>
    %cst_43 = arith.constant 0.797884583 : f32
    %116 = vector.broadcast %cst_43 : f32 to vector<16x32xf32>
    %117 = arith.mulf %116, %115 : vector<16x32xf32>
    %118 = math.tanh %117 : vector<16x32xf32>
    %cst_44 = arith.constant 1.000000e+00 : f32
    %119 = vector.broadcast %cst_44 : f32 to vector<16x32xf32>
    %120 = arith.addf %119, %118 : vector<16x32xf32>
    %121 = arith.mulf %110, %120 : vector<16x32xf32>
    %122 = vector.extract_strided_slice %10 {offsets = [0, 0, 0], sizes = [1, 32, 32], strides = [1, 1, 1]} : vector<2x32x32xf32> to vector<1x32x32xf32>
    %123 = vector.shape_cast %122 : vector<1x32x32xf32> to vector<32x32xf32>
    %cst_45 = arith.constant dense<0.000000e+00> : vector<16x32xf32>
    %124 = tpu.matmul %121, %123, %cst_45 {dimension_numbers = #tpu.dot_dimension_numbers<[1], [0], [0], [1], [0, 0, 1, 1], [], []>} : vector<16x32xf32>, vector<32x32xf32>, vector<16x32xf32> -> vector<16x32xf32>
    %125 = arith.addf %12, %124 : vector<16x32xf32>
    %126 = vector.extract_strided_slice %3 {offsets = [1, 0], sizes = [1, 32], strides = [1, 1]} : vector<2x32xf32> to vector<1x32xf32>
    %127 = vector.shape_cast %126 : vector<1x32xf32> to vector<32xf32>
    %128 = vector.shape_cast %127 : vector<32xf32> to vector<1x32xf32>
    %129 = vector.extract_strided_slice %4 {offsets = [1, 0], sizes = [1, 32], strides = [1, 1]} : vector<2x32xf32> to vector<1x32xf32>
    %130 = vector.shape_cast %129 : vector<1x32xf32> to vector<32xf32>
    %131 = vector.shape_cast %130 : vector<32xf32> to vector<1x32xf32>
    %132 = vector.extract_strided_slice %5 {offsets = [1, 0, 0], sizes = [1, 32, 32], strides = [1, 1, 1]} : vector<2x32x32xf32> to vector<1x32x32xf32>
    %133 = vector.shape_cast %132 : vector<1x32x32xf32> to vector<32x32xf32>
    %134 = vector.extract_strided_slice %6 {offsets = [1, 0], sizes = [1, 32], strides = [1, 1]} : vector<2x32xf32> to vector<1x32xf32>
    %135 = vector.shape_cast %134 : vector<1x32xf32> to vector<32xf32>
    %136 = vector.shape_cast %135 : vector<32xf32> to vector<1x32xf32>
    %137 = vector.extract_strided_slice %7 {offsets = [1, 0], sizes = [1, 32], strides = [1, 1]} : vector<2x32xf32> to vector<1x32xf32>
    %138 = vector.shape_cast %137 : vector<1x32xf32> to vector<32xf32>
    %139 = vector.shape_cast %138 : vector<32xf32> to vector<1x32xf32>
    %140 = vector.extract_strided_slice %8 {offsets = [1, 0], sizes = [1, 32], strides = [1, 1]} : vector<2x32xf32> to vector<1x32xf32>
    %141 = vector.shape_cast %140 : vector<1x32xf32> to vector<32xf32>
    %142 = vector.shape_cast %141 : vector<32xf32> to vector<1x1x32xf32>
    %143 = vector.extract_strided_slice %9 {offsets = [1, 0], sizes = [1, 1], strides = [1, 1]} : vector<2x1xf32> to vector<1x1xf32>
    %144 = vector.extract %143[0, 0] : f32 from vector<1x1xf32>
    %cst_46 = arith.constant dense<0.000000e+00> : vector<16xf32>
    %145 = vector.multi_reduction <add>, %0, %cst_46 [1] : vector<16x32xf32> to vector<16xf32>
    %146 = vector.shape_cast %145 : vector<16xf32> to vector<16x1xf32>
    %cst_47 = arith.constant 3.200000e+01 : f32
    %147 = vector.broadcast %cst_47 : f32 to vector<16x1xf32>
    %148 = arith.divf %146, %147 : vector<16x1xf32>
    %149 = vector.broadcast %148 : vector<16x1xf32> to vector<16x32xf32>
    %150 = arith.subf %0, %149 : vector<16x32xf32>
    %151 = arith.mulf %150, %150 : vector<16x32xf32>
    %cst_48 = arith.constant dense<0.000000e+00> : vector<16xf32>
    %152 = vector.multi_reduction <add>, %151, %cst_48 [1] : vector<16x32xf32> to vector<16xf32>
    %153 = vector.shape_cast %152 : vector<16xf32> to vector<16x1xf32>
    %cst_49 = arith.constant 3.200000e+01 : f32
    %154 = vector.broadcast %cst_49 : f32 to vector<16x1xf32>
    %155 = arith.divf %153, %154 : vector<16x1xf32>
    %156 = vector.broadcast %148 : vector<16x1xf32> to vector<16x32xf32>
    %157 = arith.subf %0, %156 : vector<16x32xf32>
    %cst_50 = arith.constant 9.99999974E-6 : f32
    %158 = vector.broadcast %cst_50 : f32 to vector<16x1xf32>
    %159 = arith.addf %155, %158 : vector<16x1xf32>
    %160 = math.rsqrt %159 : vector<16x1xf32>
    %161 = vector.broadcast %160 : vector<16x1xf32> to vector<16x32xf32>
    %162 = arith.mulf %157, %161 : vector<16x32xf32>
    %163 = vector.broadcast %128 : vector<1x32xf32> to vector<16x32xf32>
    %164 = arith.mulf %162, %163 : vector<16x32xf32>
    %165 = vector.broadcast %131 : vector<1x32xf32> to vector<16x32xf32>
    %166 = arith.addf %164, %165 : vector<16x32xf32>
    %cst_51 = arith.constant dense<0.000000e+00> : vector<64xf32>
    %167 = vector.multi_reduction <add>, %2, %cst_51 [1] : vector<64x32xf32> to vector<64xf32>
    %168 = vector.shape_cast %167 : vector<64xf32> to vector<64x1xf32>
    %cst_52 = arith.constant 3.200000e+01 : f32
    %169 = vector.broadcast %cst_52 : f32 to vector<64x1xf32>
    %170 = arith.divf %168, %169 : vector<64x1xf32>
    %171 = vector.broadcast %170 : vector<64x1xf32> to vector<64x32xf32>
    %172 = arith.subf %2, %171 : vector<64x32xf32>
    %173 = arith.mulf %172, %172 : vector<64x32xf32>
    %cst_53 = arith.constant dense<0.000000e+00> : vector<64xf32>
    %174 = vector.multi_reduction <add>, %173, %cst_53 [1] : vector<64x32xf32> to vector<64xf32>
    %175 = vector.shape_cast %174 : vector<64xf32> to vector<64x1xf32>
    %cst_54 = arith.constant 3.200000e+01 : f32
    %176 = vector.broadcast %cst_54 : f32 to vector<64x1xf32>
    %177 = arith.divf %175, %176 : vector<64x1xf32>
    %178 = vector.broadcast %170 : vector<64x1xf32> to vector<64x32xf32>
    %179 = arith.subf %2, %178 : vector<64x32xf32>
    %cst_55 = arith.constant 9.99999974E-6 : f32
    %180 = vector.broadcast %cst_55 : f32 to vector<64x1xf32>
    %181 = arith.addf %177, %180 : vector<64x1xf32>
    %182 = math.rsqrt %181 : vector<64x1xf32>
    %183 = vector.broadcast %182 : vector<64x1xf32> to vector<64x32xf32>
    %184 = arith.mulf %179, %183 : vector<64x32xf32>
    %185 = vector.broadcast %128 : vector<1x32xf32> to vector<64x32xf32>
    %186 = arith.mulf %184, %185 : vector<64x32xf32>
    %187 = vector.broadcast %131 : vector<1x32xf32> to vector<64x32xf32>
    %188 = arith.addf %186, %187 : vector<64x32xf32>
    %cst_56 = arith.constant dense<0.000000e+00> : vector<16x32xf32>
    %189 = tpu.matmul %166, %133, %cst_56 {dimension_numbers = #tpu.dot_dimension_numbers<[1], [0], [0], [1], [0, 0, 1, 1], [], []>} : vector<16x32xf32>, vector<32x32xf32>, vector<16x32xf32> -> vector<16x32xf32>
    %190 = vector.broadcast %136 : vector<1x32xf32> to vector<16x32xf32>
    %191 = arith.addf %189, %190 : vector<16x32xf32>
    %cst_57 = arith.constant dense<0.000000e+00> : vector<64x32xf32>
    %192 = tpu.matmul %188, %133, %cst_57 {dimension_numbers = #tpu.dot_dimension_numbers<[1], [0], [0], [1], [0, 0, 1, 1], [], []>} : vector<64x32xf32>, vector<32x32xf32>, vector<64x32xf32> -> vector<64x32xf32>
    %193 = vector.broadcast %136 : vector<1x32xf32> to vector<64x32xf32>
    %194 = arith.addf %192, %193 : vector<64x32xf32>
    %195 = vector.shape_cast %194 : vector<64x32xf32> to vector<16x4x32xf32>
    %196 = vector.broadcast %139 : vector<1x32xf32> to vector<16x32xf32>
    %197 = arith.mulf %191, %196 : vector<16x32xf32>
    %cst_58 = arith.constant dense<0.000000e+00> : vector<16xf32>
    %198 = vector.multi_reduction <add>, %197, %cst_58 [1] : vector<16x32xf32> to vector<16xf32>
    %199 = vector.shape_cast %198 : vector<16xf32> to vector<16x1xf32>
    %200 = vector.broadcast %142 : vector<1x1x32xf32> to vector<16x4x32xf32>
    %201 = arith.mulf %195, %200 : vector<16x4x32xf32>
    %cst_59 = arith.constant dense<0.000000e+00> : vector<16x4xf32>
    %202 = vector.multi_reduction <add>, %201, %cst_59 [2] : vector<16x4x32xf32> to vector<16x4xf32>
    %203 = vector.broadcast %199 : vector<16x1xf32> to vector<16x4xf32>
    %204 = arith.addf %203, %202 : vector<16x4xf32>
    %205 = vector.broadcast %144 : f32 to vector<16x4xf32>
    %206 = arith.addf %204, %205 : vector<16x4xf32>
    %cst_60 = arith.constant dense<0xFF800000> : vector<16xf32>
    %207 = vector.multi_reduction <maximumf>, %206, %cst_60 [1] : vector<16x4xf32> to vector<16xf32>
    %208 = vector.shape_cast %207 : vector<16xf32> to vector<16x1xf32>
    %209 = vector.broadcast %208 : vector<16x1xf32> to vector<16x4xf32>
    %210 = arith.subf %206, %209 : vector<16x4xf32>
    %211 = math.exp %210 : vector<16x4xf32>
    %cst_61 = arith.constant dense<0.000000e+00> : vector<16xf32>
    %212 = vector.multi_reduction <add>, %211, %cst_61 [1] : vector<16x4xf32> to vector<16xf32>
    %213 = vector.shape_cast %212 : vector<16xf32> to vector<16x1xf32>
    %214 = tpu.reciprocal %213 {approx = true} : vector<16x1xf32> -> vector<16x1xf32>
    %215 = vector.broadcast %214 : vector<16x1xf32> to vector<16x4xf32>
    %216 = arith.mulf %211, %215 : vector<16x4xf32>
    %217 = vector.shape_cast %216 : vector<16x4xf32> to vector<16x4x1xf32>
    %218 = vector.broadcast %217 : vector<16x4x1xf32> to vector<16x4x32xf32>
    %219 = arith.mulf %195, %218 : vector<16x4x32xf32>
    %cst_62 = arith.constant dense<0.000000e+00> : vector<16x32xf32>
    %220 = vector.multi_reduction <add>, %219, %cst_62 [1] : vector<16x4x32xf32> to vector<16x32xf32>
    %221 = arith.addf %0, %220 : vector<16x32xf32>
    %cst_63 = arith.constant 5.000000e-01 : f32
    %222 = vector.broadcast %cst_63 : f32 to vector<16x32xf32>
    %223 = arith.mulf %222, %221 : vector<16x32xf32>
    %cst_64 = arith.constant 4.471500e-02 : f32
    %224 = vector.broadcast %cst_64 : f32 to vector<16x32xf32>
    %225 = arith.mulf %224, %221 : vector<16x32xf32>
    %226 = arith.mulf %225, %221 : vector<16x32xf32>
    %227 = arith.mulf %226, %221 : vector<16x32xf32>
    %228 = arith.addf %221, %227 : vector<16x32xf32>
    %cst_65 = arith.constant 0.797884583 : f32
    %229 = vector.broadcast %cst_65 : f32 to vector<16x32xf32>
    %230 = arith.mulf %229, %228 : vector<16x32xf32>
    %231 = math.tanh %230 : vector<16x32xf32>
    %cst_66 = arith.constant 1.000000e+00 : f32
    %232 = vector.broadcast %cst_66 : f32 to vector<16x32xf32>
    %233 = arith.addf %232, %231 : vector<16x32xf32>
    %234 = arith.mulf %223, %233 : vector<16x32xf32>
    %235 = vector.extract_strided_slice %10 {offsets = [1, 0, 0], sizes = [1, 32, 32], strides = [1, 1, 1]} : vector<2x32x32xf32> to vector<1x32x32xf32>
    %236 = vector.shape_cast %235 : vector<1x32x32xf32> to vector<32x32xf32>
    %cst_67 = arith.constant dense<0.000000e+00> : vector<16x32xf32>
    %237 = tpu.matmul %234, %236, %cst_67 {dimension_numbers = #tpu.dot_dimension_numbers<[1], [0], [0], [1], [0, 0, 1, 1], [], []>} : vector<16x32xf32>, vector<32x32xf32>, vector<16x32xf32> -> vector<16x32xf32>
    %238 = arith.addf %125, %237 : vector<16x32xf32>
    %239 = vector.broadcast %11 : vector<1x32xf32> to vector<16x32xf32>
    %240 = arith.addf %238, %239 : vector<16x32xf32>
    %cst_68 = arith.constant 5.000000e-01 : f32
    %241 = vector.broadcast %cst_68 : f32 to vector<16x32xf32>
    %242 = arith.mulf %241, %240 : vector<16x32xf32>
    %cst_69 = arith.constant 4.471500e-02 : f32
    %243 = vector.broadcast %cst_69 : f32 to vector<16x32xf32>
    %244 = arith.mulf %243, %240 : vector<16x32xf32>
    %245 = arith.mulf %244, %240 : vector<16x32xf32>
    %246 = arith.mulf %245, %240 : vector<16x32xf32>
    %247 = arith.addf %240, %246 : vector<16x32xf32>
    %cst_70 = arith.constant 0.797884583 : f32
    %248 = vector.broadcast %cst_70 : f32 to vector<16x32xf32>
    %249 = arith.mulf %248, %247 : vector<16x32xf32>
    %250 = math.tanh %249 : vector<16x32xf32>
    %cst_71 = arith.constant 1.000000e+00 : f32
    %251 = vector.broadcast %cst_71 : f32 to vector<16x32xf32>
    %252 = arith.addf %251, %250 : vector<16x32xf32>
    %253 = arith.mulf %242, %252 : vector<16x32xf32>
    %254 = arith.addf %0, %253 : vector<16x32xf32>
    %c0_72 = arith.constant 0 : index
    %c0_73 = arith.constant 0 : index
    %255 = vector.load %arg12[%c0_72, %c0_73] : memref<16x32xf32, #tpu.memory_space<vmem>>, vector<16x32xf32>
    tpu.vector_store %arg12[%c0_72, %c0_73], %254 {strides = array<i32>} : memref<16x32xf32, #tpu.memory_space<vmem>>, vector<16x32xf32>,
    return
  }
  func.func @transform_0(%arg0: i32) -> (i32, i32) {
    %c0_i32 = arith.constant 0 : i32
    %c0_i32_0 = arith.constant 0 : i32
    return %arg0, %c0_i32 : i32, i32
  }
  func.func @transform_1(%arg0: i32) -> (i32, i32, i32) {
    %c0_i32 = arith.constant 0 : i32
    %c0_i32_0 = arith.constant 0 : i32
    %c0_i32_1 = arith.constant 0 : i32
    return %arg0, %c0_i32, %c0_i32_0 : i32, i32, i32
  }
  func.func @transform_2(%arg0: i32) -> (i32, i32) {
    %c0_i32 = arith.constant 0 : i32
    %c0_i32_0 = arith.constant 0 : i32
    %c0_i32_1 = arith.constant 0 : i32
    return %c0_i32, %c0_i32_0 : i32, i32
  }
  func.func @transform_3(%arg0: i32) -> (i32, i32) {
    %c0_i32 = arith.constant 0 : i32
    %c0_i32_0 = arith.constant 0 : i32
    %c0_i32_1 = arith.constant 0 : i32
    return %c0_i32, %c0_i32_0 : i32, i32
  }
  func.func @transform_4(%arg0: i32) -> (i32, i32, i32) {
    %c0_i32 = arith.constant 0 : i32
    %c0_i32_0 = arith.constant 0 : i32
    %c0_i32_1 = arith.constant 0 : i32
    %c0_i32_2 = arith.constant 0 : i32
    return %c0_i32, %c0_i32_0, %c0_i32_1 : i32, i32, i32
  }
  func.func @transform_5(%arg0: i32) -> (i32, i32) {
    %c0_i32 = arith.constant 0 : i32
    %c0_i32_0 = arith.constant 0 : i32
    %c0_i32_1 = arith.constant 0 : i32
    return %c0_i32, %c0_i32_0 : i32, i32
  }
  func.func @transform_6(%arg0: i32) -> (i32, i32) {
    %c0_i32 = arith.constant 0 : i32
    %c0_i32_0 = arith.constant 0 : i32
    %c0_i32_1 = arith.constant 0 : i32
    return %c0_i32, %c0_i32_0 : i32, i32
  }
  func.func @transform_7(%arg0: i32) -> (i32, i32) {
    %c0_i32 = arith.constant 0 : i32
    %c0_i32_0 = arith.constant 0 : i32
    %c0_i32_1 = arith.constant 0 : i32
    return %c0_i32, %c0_i32_0 : i32, i32
  }
  func.func @transform_8(%arg0: i32) -> (i32, i32) {
    %c0_i32 = arith.constant 0 : i32
    %c0_i32_0 = arith.constant 0 : i32
    %c0_i32_1 = arith.constant 0 : i32
    return %c0_i32, %c0_i32_0 : i32, i32
  }
  func.func @transform_9(%arg0: i32) -> (i32, i32, i32) {
    %c0_i32 = arith.constant 0 : i32
    %c0_i32_0 = arith.constant 0 : i32
    %c0_i32_1 = arith.constant 0 : i32
    %c0_i32_2 = arith.constant 0 : i32
    return %c0_i32, %c0_i32_0, %c0_i32_1 : i32, i32, i32
  }
  func.func @transform_10(%arg0: i32) -> (i32, i32) {
    %c0_i32 = arith.constant 0 : i32
    %c0_i32_0 = arith.constant 0 : i32
    %c0_i32_1 = arith.constant 0 : i32
    return %c0_i32, %c0_i32_0 : i32, i32
  }
  func.func @transform_11(%arg0: i32) -> (i32, i32) {
    %c0_i32 = arith.constant 0 : i32
    %c0_i32_0 = arith.constant 0 : i32
    return %arg0, %c0_i32 : i32, i32
  }
}

</mosaic_0001>

<bundles_post_ra>
// kernel: tpu_custom_call.1
= control target key start
LH: loop header
LB: loop body
LE: loop exit
PB: predicated region body
PF: predicated region fallthrough
CT: control target
= control target key end

     0   :  { %16 = vsyncpa [#allocation3], 0  ;;  %s3899_s0 = inlined_call_operand.hbm [shape: f32[16,32], index: 0, kind: input, shape index: {}]   ;;  %s3900_s1 = inlined_call_operand.hbm [shape: f32[16,4,32], index: 1, kind: input, shape index: {}]   ;;  %s3901_s2 = inlined_call_operand.vmem [shape: f32[2,32], index: 2, kind: input, shape index: {}]   ;;  %s3902_s3 = inlined_call_operand.vmem [shape: f32[2,32], index: 3, kind: input, shape index: {}]   ;;  %s3903_s4 = inlined_call_operand.hbm [shape: f32[2,32,32], index: 4, kind: input, shape index: {}]   ;;  %s3904_s5 = inlined_call_operand.vmem [shape: f32[2,32], index: 5, kind: input, shape index: {}]   ;;  %s3905_s6 = inlined_call_operand.vmem [shape: f32[2,32], index: 6, kind: input, shape index: {}]   ;;  %s3906_s7 = inlined_call_operand.vmem [shape: f32[2,32], index: 7, kind: input, shape index: {}]   ;;  %s3907_s8 = inlined_call_operand.vmem [shape: f32[2,1], index: 8, kind: input, shape index: {}]   ;;  %s3908_s9 = inlined_call_operand.hbm [shape: f32[2,32,32], index: 9, kind: input, shape index: {}]   ;;  %s3909_s10 = inlined_call_operand.vmem [shape: f32[1,32], index: 10, kind: input, shape index: {}]   ;;  %s3910_s11 = inlined_call_operand.hbm [shape: f32[16,32], index: 11, kind: output, shape index: {}]  }
   0x1   :  { %17 = vsyncpa [#allocation6], 0 }
   0x2   :  { %18 = vsyncpa [#allocation9], 0 }
   0x3   :  { %19 = vsyncpa [#allocation4], 0  ;;  %s2848_s17 = smov [#allocation5]   ;;  %s2730_s21 = scalar_lea.hbm %s3900_s1, 1024 }
   0x4   :  { %s37_s18 = sshll.u32 %s2848_s17, 4  ;;  %p2731_p0 = scmp.ne.s32.totalorder %s3900_s1, %s2730_s21  ;;  %s38_s18 = int_to_ptr.vmem [resolvable:$true] %s37_s18 }
   0x5   :  { %p2734_p1 = scmp.lt.u32.totalorder %s2730_s21, %s3900_s1 }
   0x7   :  { %p2736_p2 = pnand %p2734_p1, %p2731_p0 }
   0x9   :  { %2739 = shalt.err (!%p2736_p2)
}
   0xa   :  { %s2740_s26 = scalar_lea.vmem %s38_s18, 1024  ;;  %p2745_p4 = scmp.lt.s32.totalorder %s38_s18, %s38_s18 }
   0xb   :  { %p2741_p3 = scmp.ne.s32.totalorder %s38_s18, %s2740_s26  ;;  %p2746_p5 = scmp.lt.s32.totalorder %s2740_s26, %s2740_s26 }
   0xd   :  { %p2747_p6 = por %p2746_p5, %p2745_p4 }
   0xf   :  { %p2748_p7 = pnand %p2747_p6, %p2741_p3 }
  0x11   :  { %2751 = shalt.err (!%p2748_p7)
}
  0x12   :  { %s2849_s27 = smov 64   ;;  %s2850_s28 = smov 4  }
  0x13   :  { %43 = dma.hbm_to_vmem [thread:$0]  %s3900_s1, 1024, %s38_s18, [#allocation6], %s2849_s27, %s2849_s27, %s2850_s28  }
  0x14   :  { %s2851_s12 = smov [#allocation2]   ;;  %s2752_s16 = scalar_lea.hbm %s3899_s0, 256 }
  0x15   :  { %s25_s13 = sshll.u32 %s2851_s12, 4  ;;  %p2753_p8 = scmp.ne.s32.totalorder %s3899_s0, %s2752_s16  ;;  %s26_s13 = int_to_ptr.vmem [resolvable:$true] %s25_s13 }
  0x16   :  { %p2756_p9 = scmp.lt.u32.totalorder %s2752_s16, %s3899_s0 }
  0x18   :  { %p2758_p10 = pnand %p2756_p9, %p2753_p8 }
  0x1a   :  { %2761 = shalt.err (!%p2758_p10)
}
  0x1b   :  { %s2762_s22 = scalar_lea.vmem %s26_s13, 256  ;;  %p2767_p12 = scmp.lt.s32.totalorder %s26_s13, %s26_s13 }
  0x1c   :  { %p2763_p11 = scmp.ne.s32.totalorder %s26_s13, %s2762_s22  ;;  %p2768_p13 = scmp.lt.s32.totalorder %s2762_s22, %s2762_s22 }
  0x1e   :  { %p2769_p0 = por %p2768_p13, %p2767_p12 }
  0x20   :  { %p2770_p1 = pnand %p2769_p0, %p2763_p11 }
  0x22   :  { %2773 = shalt.err (!%p2770_p1)
}
  0x23   :  { %s2852_s1 = smov 128   ;;  %s2853_s18 = smov 8  }
  0x24   :  { %31 = dma.hbm_to_vmem [thread:$0]  %s3899_s0, 256, %s26_s13, [#allocation3], %s2852_s1, %s2852_s1, %s2853_s18  }
  0x25   :  { %s2854_s25 = smov [#allocation7]   ;;  %s2855_s27 = smov [#allocation8]  }
  0x26   :  { %s53_s26 = sshll.u32 %s2854_s25, 4  ;;  %s73_s28 = sshll.u32 %s2855_s27, 4  ;;  %s54_s26 = int_to_ptr.vmem [resolvable:$true] %s53_s26  ;;  %s2946_s28 = int_to_ptr.vmem [resolvable:$true] %s73_s28 }
  0x27   :  { %s2774_s12 = scalar_lea.hbm %s3903_s4, 1024 }
  0x28   :  { %p2775_p2 = scmp.ne.s32.totalorder %s3903_s4, %s2774_s12  ;;  %p2778_p3 = scmp.lt.u32.totalorder %s2774_s12, %s3903_s4 }
  0x2a   :  { %p2780_p4 = pnand %p2778_p3, %p2775_p2 }
  0x2c   :  { %2783 = shalt.err (!%p2780_p4)
}
  0x2d   :  { %s2784_s0 = scalar_lea.vmem %s54_s26, 1024  ;;  %p2789_p6 = scmp.lt.s32.totalorder %s54_s26, %s54_s26 }
  0x2e   :  { %p2785_p5 = scmp.ne.s32.totalorder %s54_s26, %s2784_s0  ;;  %p2790_p7 = scmp.lt.s32.totalorder %s2784_s0, %s2784_s0 }
  0x30   :  { %p2791_p8 = por %p2790_p7, %p2789_p6 }
  0x32   :  { %p2792_p9 = pnand %p2791_p8, %p2785_p5 }
  0x34   :  { %2795 = shalt.err (!%p2792_p9)
}
  0x35   :  { %59 = dma.hbm_to_vmem [thread:$0]  %s3903_s4, 1024, %s54_s26, [#allocation6], %s2852_s1, %s2852_s1, %s2853_s18  }
  0x36   :  { %s2796_s22 = scalar_lea.hbm %s3908_s9, 1024 }
  0x37   :  { %p2797_p10 = scmp.ne.s32.totalorder %s3908_s9, %s2796_s22  ;;  %p2800_p11 = scmp.lt.u32.totalorder %s2796_s22, %s3908_s9 }
  0x39   :  { %p2802_p12 = pnand %p2800_p11, %p2797_p10 }
  0x3b   :  { %2805 = shalt.err (!%p2802_p12)
}
  0x3c   :  { %s2806_s29 = scalar_lea.vmem %s2946_s28, 1024  ;;  %p2811_p0 = scmp.lt.s32.totalorder %s2946_s28, %s2946_s28 }
  0x3d   :  { %p2807_p13 = scmp.ne.s32.totalorder %s2946_s28, %s2806_s29  ;;  %p2812_p1 = scmp.lt.s32.totalorder %s2806_s29, %s2806_s29 }
  0x3f   :  { %p2813_p2 = por %p2812_p1, %p2811_p0 }
  0x41   :  { %p2814_p3 = pnand %p2813_p2, %p2807_p13 }
  0x43   :  { %2817 = shalt.err (!%p2814_p3)
}
  0x44   :  { %79 = dma.hbm_to_vmem [thread:$0]  %s3908_s9, 1024, %s2946_s28, [#allocation9], %s2852_s1, %s2852_s1, %s2853_s18  }
  0x45   :  { %2840 = dma.done.wait [#allocation3], 256  }
  0x46   :  { %2841 = vsyncadd [#allocation3], 4294967040 }
  0x47   :  { %2842 = dma.done.wait [#allocation6], 2048  }
  0x48   :  { %2843 = vsyncadd [#allocation6], 4294965248 }
  0x49   :  { %2844 = dma.done.wait [#allocation9], 1024  }
  0x4a   :  { %2845 = vsyncadd [#allocation9], 4294966272  ;;  %vm136_vm0 = vcmask 261120   ;;  %v94_v0 = vld [vmem:[#allocation2] sm:$0xff]  ;;  %v2983_v1 = vld [vmem:[#allocation5] sm:$0xf]  ;;  %v164_v36 = vlaneseq }
  0x4b   :  { %v2985_v2 = vld [vmem:[#allocation5 + $0x4] sm:$0xf]  ;;  %v137_v3 = vsel %vm136_vm0, %v94_v0, 0.0  ;;  %v2990_v5 = vld [vmem:[#allocation2 + $0x8] sm:$0xff]  ;;  %v2992_v6 = vld [vmem:[#allocation5 + $0x8] sm:$0xf] }
  0x4c   :  { %v192_v4 = vcombine.low %v2983_v1, %v2985_v2  ;;  %v2994_v7 = vld [vmem:[#allocation5 + $0xc] sm:$0xf]  ;;  %138 = vadd.xlane.f32.xlu0 %v137_v3  ;;  %v2998_v9 = vld [vmem:[#allocation5 + $0x10] sm:$0xf]  ;;  %v3000_v10 = vld [vmem:[#allocation5 + $0x14] sm:$0xf] }
  0x4d   :  { %v193_v8 = vcombine.low %v2992_v6, %v2994_v7  ;;  %v140_v12 = vsel %vm136_vm0, %v2990_v5, 0.0  ;;  %v194_v13 = vcombine.low %v2998_v9, %v3000_v10  ;;  %v3007_v14 = vld [vmem:[#allocation5 + $0x18] sm:$0xf]  ;;  %v3009_v15 = vld [vmem:[#allocation5 + $0x1c] sm:$0xf]  ;;  %v3045_v41 = vshrl.u32 %v164_v36, 7 }
  0x4e   :  { %v208_v11 = vsel %vm136_vm0, %v192_v4, 0.0  ;;  %v3011_v16 = vld [vmem:[#allocation5 + $0x20] sm:$0xf]  ;;  %v3013_v17 = vld [vmem:[#allocation5 + $0x24] sm:$0xf]  ;;  %v195_v19 = vcombine.low %v3007_v14, %v3009_v15  ;;  %vm964_vm1 = vcmask 257024  }
  0x4f   :  { %209 = vadd.xlane.f32.xlu1 %v208_v11  ;;  %v211_v18 = vsel %vm136_vm0, %v193_v8, 0.0  ;;  %v3018_v20 = vld [vmem:[#allocation5 + $0x28] sm:$0xf]  ;;  %v3020_v21 = vld [vmem:[#allocation5 + $0x2c] sm:$0xf]  ;;  %v214_v22 = vsel %vm136_vm0, %v194_v13, 0.0  ;;  %v196_v23 = vcombine.low %v3011_v16, %v3013_v17 }
  0x50   :  { %141 = vadd.xlane.f32.xlu0 %v140_v12  ;;  %v3025_v24 = vld [vmem:[#allocation5 + $0x30] sm:$0xf]  ;;  %v3027_v25 = vld [vmem:[#allocation5 + $0x34] sm:$0xf]  ;;  %v217_v26 = vsel %vm136_vm0, %v195_v19, 0.0  ;;  %v197_v27 = vcombine.low %v3018_v20, %v3020_v21  ;;  %vm1095_vm2 = vcmask 1041409  }
  0x51   :  { %v3032_v28 = vld [vmem:[#allocation5 + $0x38] sm:$0xf]  ;;  %v3034_v29 = vld [vmem:[#allocation5 + $0x3c] sm:$0xf]  ;;  %v220_v30 = vsel %vm136_vm0, %v196_v23, 0.0  ;;  %v198_v31 = vcombine.low %v3025_v24, %v3027_v25  ;;  %vm1097_vm3 = vcmask 1042434  }
  0x52   :  { %v223_v32 = vsel %vm136_vm0, %v197_v27, 0.0  ;;  %v199_v33 = vcombine.low %v3032_v28, %v3034_v29  ;;  %v2856_v37 = vmov 839922192   ;;  %v2857_v39 = vmov 1985246804  }
  0x53   :  { %212 = vadd.xlane.f32.xlu1 %v211_v18  ;;  %v226_v34 = vsel %vm136_vm0, %v198_v31, 0.0  ;;  %v249_v38 = vunpack.c.l.s4 %v2856_v37  ;;  %v256_v40 = vunpack.c.l.s4 %v2857_v39  ;;  %vm1099_vm4 = vcmask 1043459  }
  0x54   :  { %215 = vadd.xlane.f32.xlu0 %v214_v22  ;;  %v229_v35 = vsel %vm136_vm0, %v199_v33, 0.0  ;;  %vm1101_vm5 = vcmask 1044484   ;;  %vm1105_vm6 = vcmask 1046534   ;;  %vm1103_vm7 = vcmask 1045509  }
  0x55   :  { %v250_v42 = vunpack.c.0.s8 %v249_v38  ;;  %v257_v43 = vunpack.c.0.s8 %v256_v40  ;;  %vm1107_vm8 = vcmask 1047559   ;;  %vm1123_vm9 = vcmask 31744  }
  0x57   :  { %218 = vadd.xlane.f32.xlu1 %v217_v26  ;;  %v3048_v46 = vsub.s32 %v250_v42, %v3045_v41  ;;  %v3051_v47 = vsub.s32 %v257_v43, %v3045_v41 }
  0x58   :  { %221 = vadd.xlane.f32.xlu0 %v220_v30 }
  0x5b   :  { %224 = vadd.xlane.f32.xlu1 %v223_v32 }
  0x5c   :  { %227 = vadd.xlane.f32.xlu0 %v226_v34 }
  0x5f   :  { %230 = vadd.xlane.f32.xlu1 %v229_v35 }
  0xd9   :  { %v139_v44 = vpop.xlane.xlu0 %138 }
  0xda   :  { %v144_v45 = vmul.f32 0.03125, %v139_v44 }
  0xdc   :  { %v210_v48 = vpop.xlane.xlu1 %209  ;;  %v3053_v49 = vsub.f32 %v94_v0, %v144_v45 }
  0xdd   :  { %v232_v50 = vmul.f32 0.03125, %v210_v48  ;;  %v142_v51 = vpop.xlane.xlu0 %141 }
  0xde   :  { %v145_v54 = vmul.f32 0.03125, %v142_v51  ;;  %v148_v55 = vmul.f32 %v3053_v49, %v3053_v49 }
  0xdf   :  { %v254_v52 = vrot.slane %v232_v50, %v3048_v46  ;;  %v261_v53 = vrot.slane %v232_v50, %v3051_v47 }
  0xe0   :  { %v213_v56 = vpop.xlane.xlu1 %212  ;;  %v3066_v59 = vsub.f32 %v2990_v5, %v145_v54  ;;  %v150_v61 = vsel %vm136_vm0, %v148_v55, 0.0 }
  0xe1   :  { %v3060_v57 = vsub.f32 %v2983_v1, %v254_v52  ;;  %v3063_v58 = vsub.f32 %v2985_v2, %v261_v53  ;;  %v233_v60 = vmul.f32 0.03125, %v213_v56  ;;  %v216_v62 = vpop.xlane.xlu0 %215  ;;  %151 = vadd.xlane.f32.xlu0 %v150_v61 }
  0xe2   :  { %v234_v3 = vmul.f32 0.03125, %v216_v62  ;;  %v149_v1 = vmul.f32 %v3066_v59, %v3066_v59 }
  0xe3   :  { %v268_v63 = vrot.slane %v233_v60, %v3048_v46  ;;  %v275_v0 = vrot.slane %v233_v60, %v3051_v47  ;;  %v392_v2 = vmul.f32 %v3060_v57, %v3060_v57  ;;  %v393_v5 = vmul.f32 %v3063_v58, %v3063_v58 }
  0xe4   :  { %v219_v4 = vpop.xlane.xlu1 %218  ;;  %v282_v12 = vrot.slane %v234_v3, %v3048_v46  ;;  %v289_v13 = vrot.slane %v234_v3, %v3051_v47  ;;  %v153_v19 = vsel %vm136_vm0, %v149_v1, 0.0 }
  0xe5   :  { %v3078_v8 = vsub.f32 %v2992_v6, %v268_v63  ;;  %v3081_v11 = vsub.f32 %v2994_v7, %v275_v0  ;;  %v235_v18 = vmul.f32 0.03125, %v219_v4  ;;  %v222_v22 = vpop.xlane.xlu0 %221  ;;  %v424_v23 = vcombine.low %v392_v2, %v393_v5  ;;  %154 = vadd.xlane.f32.xlu1 %v153_v19 }
  0xe6   :  { %v3087_v26 = vsub.f32 %v2998_v9, %v282_v12  ;;  %v3090_v27 = vsub.f32 %v3000_v10, %v289_v13  ;;  %v236_v6 = vmul.f32 0.03125, %v222_v22 }
  0xe7   :  { %v394_v7 = vmul.f32 %v3078_v8, %v3078_v8  ;;  %v296_v30 = vrot.slane %v235_v18, %v3048_v46  ;;  %v303_v31 = vrot.slane %v235_v18, %v3051_v47  ;;  %v440_v33 = vsel %vm136_vm0, %v424_v23, 0.0 }
  0xe8   :  { %v225_v32 = vpop.xlane.xlu1 %224  ;;  %v395_v34 = vmul.f32 %v3081_v11, %v3081_v11  ;;  %v310_v9 = vrot.slane %v236_v6, %v3048_v46  ;;  %v317_v10 = vrot.slane %v236_v6, %v3051_v47  ;;  %441 = vadd.xlane.f32.xlu0 %v440_v33  ;;  %v396_v37 = vmul.f32 %v3087_v26, %v3087_v26  ;;  %v115_v33 = vld [vmem:[#allocation7 + $0x8] sm:$0xff] }
  0xe9   :  { %v237_v35 = vmul.f32 0.03125, %v225_v32  ;;  %v3104_v38 = vsub.f32 %v3007_v14, %v296_v30  ;;  %v3107_v39 = vsub.f32 %v3009_v15, %v303_v31  ;;  %v228_v40 = vpop.xlane.xlu0 %227  ;;  %v397_v43 = vmul.f32 %v3090_v27, %v3090_v27  ;;  %v114_v32 = vld [vmem:[#allocation7] sm:$0xff] }
  0xea   :  { %v425_v42 = vcombine.low %v394_v7, %v395_v34  ;;  %v3112_v44 = vsub.f32 %v3011_v16, %v310_v9  ;;  %v3115_v45 = vsub.f32 %v3013_v17, %v317_v10  ;;  %v238_v14 = vmul.f32 0.03125, %v228_v40  ;;  %v116_v9 = vld [vmem:[#allocation7 + $0x10] sm:$0xff]  ;;  %v117_v10 = vld [vmem:[#allocation7 + $0x18] sm:$0xff]  ;;  %v119_v40 = vld [vmem:[#allocation7 + $0x28] sm:$0xff] }
  0xeb   :  { %v324_v48 = vrot.slane %v237_v35, %v3048_v46  ;;  %v331_v50 = vrot.slane %v237_v35, %v3051_v47  ;;  %v426_v52 = vcombine.low %v396_v37, %v397_v43  ;;  %v398_v53 = vmul.f32 %v3104_v38, %v3104_v38  ;;  %v118_v37 = vld [vmem:[#allocation7 + $0x20] sm:$0xff] }
  0xec   :  { %v231_v51 = vpop.xlane.xlu1 %230  ;;  %v443_v15 = vsel %vm136_vm0, %v425_v42, 0.0  ;;  %v399_v55 = vmul.f32 %v3107_v39, %v3107_v39  ;;  %v338_v56 = vrot.slane %v238_v14, %v3048_v46  ;;  %v345_v60 = vrot.slane %v238_v14, %v3051_v47 }
  0xed   :  { %v3123_v54 = vsub.f32 %v3018_v20, %v324_v48  ;;  %v3126_v16 = vsub.f32 %v3020_v21, %v331_v50  ;;  %v239_v17 = vmul.f32 0.03125, %v231_v51  ;;  %444 = vadd.xlane.f32.xlu1 %v443_v15  ;;  %v446_v61 = vsel %vm136_vm0, %v426_v52, 0.0 }
  0xee   :  { %v400_v62 = vmul.f32 %v3112_v44, %v3112_v44  ;;  %447 = vadd.xlane.f32.xlu0 %v446_v61  ;;  %v427_v21 = vcombine.low %v398_v53, %v399_v55  ;;  %v401_v0 = vmul.f32 %v3115_v45, %v3115_v45  ;;  %v3140_v3 = vsub.f32 %v3025_v24, %v338_v56  ;;  %v112_v61 = vld [vmem:[%s3901_s2] sm:$0x3] }
  0xef   :  { %v352_v20 = vrot.slane %v239_v17, %v3048_v46  ;;  %v359_v63 = vrot.slane %v239_v17, %v3051_v47  ;;  %v3143_v1 = vsub.f32 %v3027_v25, %v345_v60  ;;  %v402_v4 = vmul.f32 %v3123_v54, %v3123_v54 }
  0xf0   :  { %v403_v2 = vmul.f32 %v3126_v16, %v3126_v16  ;;  %v449_v13 = vsel %vm136_vm0, %v427_v21, 0.0  ;;  %v428_v18 = vcombine.low %v400_v62, %v401_v0  ;;  %v404_v25 = vmul.f32 %v3140_v3, %v3140_v3  ;;  %v113_v21 = vld [vmem:[%s3902_s3] sm:$0x3] }
  0xf1   :  { %v3150_v5 = vsub.f32 %v3032_v28, %v352_v20  ;;  %v3153_v12 = vsub.f32 %v3034_v29, %v359_v63  ;;  %450 = vadd.xlane.f32.xlu1 %v449_v13  ;;  %v405_v19 = vmul.f32 %v3143_v1, %v3143_v1  ;;  %v2607_v34 = vpack.c.bf16 %v115_v33, %v114_v32 }
  0xf2   :  { %v429_v24 = vcombine.low %v402_v4, %v403_v2  ;;  %v452_v22 = vsel %vm136_vm0, %v428_v18, 0.0  ;;  %v2611_v35 = vpack.c.bf16 %v117_v10, %v116_v9  ;;  %v3168_v42 = vpack.c.bf16 %v119_v40, %v118_v37  ;;  %v120_v10 = vld [vmem:[#allocation7 + $0x30] sm:$0xff] }
  0xf3   :  { %v406_v28 = vmul.f32 %v3150_v5, %v3150_v5  ;;  %v407_v29 = vmul.f32 %v3153_v12, %v3153_v12  ;;  %453 = vadd.xlane.f32.xlu0 %v452_v22  ;;  %v430_v6 = vcombine.low %v404_v25, %v405_v19  ;;  %2608 = vmatprep.subr.bf16.mxu0 %v2607_v34  ;;  %v3172_v56 = vsub.s32 0, %v3045_v41 }
  0xf4   :  { %v455_v23 = vsel %vm136_vm0, %v429_v24, 0.0  ;;  %2616 = vmatprep.subr.bf16.mxu1 %v2607_v34  ;;  %2610 = vmatpush3.bf16.msra.mxu0 %v2607_v34  ;;  %v3181_v0 = vsub.s32 1, %v3045_v41 }
  0xf5   :  { %v431_v7 = vcombine.low %v406_v28, %v407_v29  ;;  %456 = vadd.xlane.f32.xlu1 %v455_v23  ;;  %v458_v30 = vsel %vm136_vm0, %v430_v6, 0.0  ;;  %2618 = vmatpush3.bf16.msra.mxu1 %v2607_v34  ;;  %v3184_v4 = vrot.slane %v112_v61, %v3172_v56  ;;  %v3188_v19 = vrot.slane %v113_v21, %v3172_v56 }
  0xf6   :  { %2612 = vmatprep.subr.bf16.mxu0 %v2611_v35  ;;  %2620 = vmatprep.subr.bf16.mxu1 %v2611_v35  ;;  %v3191_v28 = vrot.slane %v112_v61, %v3181_v0 }
  0xf7   :  { %v461_v31 = vsel %vm136_vm0, %v431_v7, 0.0  ;;  %459 = vadd.xlane.f32.xlu0 %v458_v30 }
  0xf8   :  { %2614 = vmatpush3.bf16.msra.mxu0 %v2611_v35  ;;  %v3203_v32 = vcombine.high %v3191_v28, %v3191_v28 }
  0xf9   :  { %462 = vadd.xlane.f32.xlu1 %v461_v31  ;;  %2622 = vmatpush3.bf16.msra.mxu1 %v2611_v35  ;;  %v3195_v31 = vrot.slane %v113_v21, %v3181_v0  ;;  %v121_v35 = vld [vmem:[#allocation7 + $0x38] sm:$0xff] }
  0xfa   :  { %2624 = vmatprep.subr.bf16.mxu0 %v3168_v42 }
 0x16e   :  { %v152_v43 = vpop.xlane.xlu0 %151 }
 0x16f   :  { %v156_v48 = vmul.f32 0.03125, %v152_v43 }
 0x171   :  { %v158_v50 = vadd.f32 1e-05, %v156_v48 }
 0x172   :  { %v155_v14 = vpop.xlane.xlu1 %154 }
 0x173   :  { %2680 = vrsqrt.f32 %v158_v50  ;;  %v157_v51 = vmul.f32 0.03125, %v155_v14  ;;  %v3210_v50 = vcombine.high %v3188_v19, %v3188_v19  ;;  %v3214_v14 = vcombine.high %v3195_v31, %v3195_v31 }
 0x175   :  { %v442_v15 = vpop.xlane.xlu0 %441  ;;  %v159_v52 = vadd.f32 1e-05, %v157_v51 }
 0x176   :  { %v464_v53 = vmul.f32 0.03125, %v442_v15 }
 0x177   :  { %2682 = vrsqrt.f32 %v159_v52 }
 0x178   :  { %v472_v17 = vadd.f32 1e-05, %v464_v53 }
 0x17a   :  { %v445_v55 = vpop.xlane.xlu1 %444  ;;  %2684 = vrsqrt.f32 %v472_v17 }
 0x17b   :  { %v465_v60 = vmul.f32 0.03125, %v445_v55  ;;  %v448_v62 = vpop.xlane.xlu0 %447  ;;  %v3220_v55 = vpack.c.bf16 %v121_v35, %v120_v10 }
 0x17c   :  { %v466_v63 = vmul.f32 0.03125, %v448_v62 }
 0x17d   :  { %v473_v20 = vadd.f32 1e-05, %v465_v60  ;;  %v2681_v2 = vpop.eup %2680 }
 0x17e   :  { %v474_v13 = vadd.f32 1e-05, %v466_v63  ;;  %v451_v18 = vpop.xlane.xlu1 %450  ;;  %v162_v25 = vmul.f32 %v2681_v2, %v3053_v49  ;;  %v3199_v49 = vcombine.high %v3184_v4, %v3184_v4 }
 0x17f   :  { %2686 = vrsqrt.f32 %v473_v20  ;;  %v467_v24 = vmul.f32 0.03125, %v451_v18 }
 0x180   :  { %2688 = vrsqrt.f32 %v474_v13  ;;  %v454_v22 = vpop.xlane.xlu0 %453  ;;  %v168_v6 = vmul.f32 %v3184_v4, %v162_v25  ;;  %v1444_v43 = vmul.f32 %v3191_v28, %v162_v25 }
 0x181   :  { %v475_v29 = vadd.f32 1e-05, %v467_v24  ;;  %v468_v23 = vmul.f32 0.03125, %v454_v22  ;;  %v2683_v7 = vpop.eup %2682 }
 0x182   :  { %v457_v30 = vpop.xlane.xlu1 %456  ;;  %v174_v9 = vadd.f32 %v3188_v19, %v168_v6  ;;  %v163_v48 = vmul.f32 %v2683_v7, %v3066_v59  ;;  %v1450_v2 = vadd.f32 %v3195_v31, %v1444_v43 }
 0x183   :  { %2690 = vrsqrt.f32 %v475_v29  ;;  %v476_v33 = vadd.f32 1e-05, %v468_v23  ;;  %v469_v34 = vmul.f32 0.03125, %v457_v30 }
 0x184   :  { %v2685_v37 = vpop.eup %2684  ;;  %v460_v40 = vpop.xlane.xlu0 %459  ;;  %2531 = vmatprep.mubr.msk.f32.mxu0 %vm136_vm0, %v174_v9  ;;  %v169_v17 = vmul.f32 %v3184_v4, %v163_v48  ;;  %v1445_v59 = vmul.f32 %v3191_v28, %v163_v48 }
 0x185   :  { %2692 = vrsqrt.f32 %v476_v33  ;;  %v477_v51 = vadd.f32 1e-05, %v469_v34  ;;  %v470_v15 = vmul.f32 0.03125, %v460_v40  ;;  %v502_v52 = vrot.slane %v2685_v37, %v3048_v46 }
 0x186   :  { %v463_v53 = vpop.xlane.xlu1 %462  ;;  %v509_v60 = vrot.slane %v2685_v37, %v3051_v47  ;;  %v175_v21 = vadd.f32 %v3188_v19, %v169_v17  ;;  %v1451_v18 = vadd.f32 %v3195_v31, %v1445_v59 }
 0x187   :  { %2694 = vrsqrt.f32 %v477_v51  ;;  %v478_v61 = vadd.f32 1e-05, %v470_v15  ;;  %v471_v62 = vmul.f32 0.03125, %v463_v53  ;;  %v624_v20 = vmul.f32 %v502_v52, %v3060_v57 }
 0x188   :  { %v625_v13 = vmul.f32 %v509_v60, %v3063_v58  ;;  %2532 = vmatmul.mubr.msk.f32.vlgmr.msra.gmra.mrb[0].mxu0 %vm136_vm0, %v175_v21 }
 0x189   :  { %v2687_v63 = vpop.eup %2686  ;;  %2696 = vrsqrt.f32 %v478_v61  ;;  %v479_v22 = vadd.f32 1e-05, %v471_v62  ;;  %v643_v57 = vmul.f32 %v624_v20, %v3184_v4  ;;  %v1455_v6 = vmul.f32 %v3191_v28, %v624_v20  ;;  %2626 = vmatpush3.bf16.msra.mxu0 %v3168_v42  ;;  %2562 = vmatprep.mubr.msk.f32.mxu0 %vm136_vm0, %v1450_v2 }
 0x18a   :  { %v516_v24 = vrot.slane %v2687_v63, %v3048_v46  ;;  %v523_v25 = vrot.slane %v2687_v63, %v3051_v47  ;;  %v2689_v29 = vpop.eup %2688  ;;  %v644_v23 = vmul.f32 %v3199_v49, %v625_v13  ;;  %v1456_v7 = vmul.f32 %v3203_v32, %v625_v13  ;;  %2628 = vmatprep.subr.bf16.mxu0 %v3220_v55 }
 0x18b   :  { %v530_v58 = vrot.slane %v2689_v29, %v3048_v46  ;;  %v537_v30 = vrot.slane %v2689_v29, %v3051_v47  ;;  %2698 = vrsqrt.f32 %v479_v22  ;;  %v662_v34 = vadd.f32 %v643_v57, %v3188_v19 }
 0x18c   :  { %v626_v33 = vmul.f32 %v516_v24, %v3078_v8  ;;  %v663_v9 = vadd.f32 %v3210_v50, %v644_v23  ;;  %v1474_v10 = vadd.f32 %v1455_v6, %v3195_v31  ;;  %v1475_v35 = vadd.f32 %v3214_v14, %v1456_v7 }
 0x18d   :  { %v2691_v37 = vpop.eup %2690  ;;  %v627_v40 = vmul.f32 %v523_v25, %v3081_v11  ;;  %v628_v51 = vmul.f32 %v530_v58, %v3087_v26  ;;  %2630 = vmatpush3.bf16.msra.mxu0 %v3220_v55  ;;  %v629_v61 = vmul.f32 %v537_v30, %v3090_v27 }
 0x18e   :  { %v645_v43 = vmul.f32 %v626_v33, %v3184_v4  ;;  %v1457_v48 = vmul.f32 %v3191_v28, %v626_v33  ;;  %v544_v8 = vrot.slane %v2691_v37, %v3048_v46  ;;  %v551_v15 = vrot.slane %v2691_v37, %v3051_v47  ;;  %2632 = vmatprep.subr.bf16.mxu0 %v3168_v42 }
 0x18f   :  { %v779_v52 = vcombine.low %v662_v34, %v663_v9  ;;  %v1591_v53 = vcombine.low %v1474_v10, %v1475_v35  ;;  %v2693_v17 = vpop.eup %2692  ;;  %v646_v59 = vmul.f32 %v3199_v49, %v627_v40  ;;  %v1458_v11 = vmul.f32 %v3203_v32, %v627_v40 }
 0x190   :  { %v664_v60 = vadd.f32 %v645_v43, %v3188_v19  ;;  %v558_v62 = vrot.slane %v2693_v17, %v3048_v46  ;;  %v565_v26 = vrot.slane %v2693_v17, %v3051_v47  ;;  %v647_v20 = vmul.f32 %v628_v51, %v3184_v4  ;;  %2563 = vmatmul.mubr.msk.f32.vlgmr.msra.gmra.mrb[2].mxu0 %vm136_vm0, %v1451_v18 }
 0x191   :  { %2542 = vmatprep.mubr.msk.f32.mxu1 %vm136_vm0, %v779_v52  ;;  %v2695_v63 = vpop.eup %2694  ;;  %v665_v21 = vadd.f32 %v3210_v50, %v646_v59  ;;  %v648_v2 = vmul.f32 %v3199_v49, %v629_v61  ;;  %v630_v13 = vmul.f32 %v544_v8, %v3104_v38  ;;  %v631_v24 = vmul.f32 %v551_v15, %v3107_v39 }
 0x192   :  { %v572_v27 = vrot.slane %v2695_v63, %v3048_v46  ;;  %v579_v25 = vrot.slane %v2695_v63, %v3051_v47  ;;  %v666_v22 = vadd.f32 %v647_v20, %v3188_v19  ;;  %v1476_v29 = vadd.f32 %v1457_v48, %v3195_v31  ;;  %2634 = vmatpush3.bf16.msra.mxu0 %v3168_v42 }
 0x193   :  { %v2697_v57 = vpop.eup %2696  ;;  %2573 = vmatprep.mubr.msk.f32.mxu0 %vm136_vm0, %v1591_v53  ;;  %v780_v23 = vcombine.low %v664_v60, %v665_v21  ;;  %v667_v38 = vadd.f32 %v3210_v50, %v648_v2  ;;  %v649_v39 = vmul.f32 %v630_v13, %v3184_v4  ;;  %2636 = vmatprep.subr.bf16.mxu0 %v3220_v55 }
 0x194   :  { %v586_v6 = vrot.slane %v2697_v57, %v3048_v46  ;;  %v593_v7 = vrot.slane %v2697_v57, %v3051_v47  ;;  %v650_v18 = vmul.f32 %v3199_v49, %v631_v24  ;;  %v1477_v58 = vadd.f32 %v3214_v14, %v1458_v11 }
 0x195   :  { %v2699_v30 = vpop.eup %2698  ;;  %2543 = vmatmul.mubr.msk.f32.vlgmr.msra.gmra.mrb[0].mxu1 %vm136_vm0, %v780_v23  ;;  %v781_v42 = vcombine.low %v666_v22, %v667_v38  ;;  %v668_v33 = vadd.f32 %v649_v39, %v3188_v19  ;;  %v632_v34 = vmul.f32 %v558_v62, %v3112_v44  ;;  %v633_v9 = vmul.f32 %v565_v26, %v3115_v45 }
 0x196   :  { %v600_v10 = vrot.slane %v2699_v30, %v3048_v46  ;;  %v607_v35 = vrot.slane %v2699_v30, %v3051_v47  ;;  %v669_v37 = vadd.f32 %v3210_v50, %v650_v18  ;;  %v1592_v40 = vcombine.low %v1476_v29, %v1477_v58  ;;  %2638 = vmatpush3.bf16.msra.mxu0 %v3220_v55 }
 0x197   :  { %2545 = vmatprep.mubr.msk.f32.mxu1 %vm136_vm0, %v781_v42  ;;  %v651_v43 = vmul.f32 %v632_v34, %v3184_v4  ;;  %v652_v48 = vmul.f32 %v3199_v49, %v633_v9  ;;  %v1459_v8 = vmul.f32 %v3191_v28, %v628_v51  ;;  %v1460_v45 = vmul.f32 %v3203_v32, %v629_v61 }
 0x198   :  { %v782_v44 = vcombine.low %v668_v33, %v669_v37  ;;  %v634_v46 = vmul.f32 %v572_v27, %v3123_v54  ;;  %v635_v47 = vmul.f32 %v579_v25, %v3126_v16  ;;  %v1461_v55 = vmul.f32 %v3191_v28, %v630_v13 }
 0x199   :  { %v670_v15 = vadd.f32 %v651_v43, %v3188_v19  ;;  %v671_v52 = vadd.f32 %v3210_v50, %v652_v48  ;;  %v1478_v53 = vadd.f32 %v1459_v8, %v3195_v31  ;;  %2574 = vmatmul.mubr.msk.f32.vlgmr.msra.gmra.mrb[4].mxu0 %vm136_vm0, %v1592_v40  ;;  %v1479_v51 = vadd.f32 %v3214_v14, %v1460_v45 }
 0x19a   :  { %2546 = vmatmul.mubr.msk.f32.gmra.mrb[2].mxu1 %vm136_vm0, %v782_v44  ;;  %v653_v17 = vmul.f32 %v634_v46, %v3184_v4  ;;  %v654_v54 = vmul.f32 %v3199_v49, %v635_v47  ;;  %v1462_v16 = vmul.f32 %v3203_v32, %v631_v24  ;;  %v1480_v60 = vadd.f32 %v1461_v55, %v3195_v31 }
 0x19b   :  { %v783_v59 = vcombine.low %v670_v15, %v671_v52  ;;  %v636_v11 = vmul.f32 %v586_v6, %v3140_v3  ;;  %v1593_v61 = vcombine.low %v1478_v53, %v1479_v51  ;;  %v637_v20 = vmul.f32 %v593_v7, %v3143_v1  ;;  %v124_v53 = vld [vmem:[%s3906_s7] sm:$0x3] }
 0x19c   :  { %v672_v62 = vadd.f32 %v653_v17, %v3188_v19  ;;  %v673_v26 = vadd.f32 %v3210_v50, %v654_v54  ;;  %v1481_v63 = vadd.f32 %v3214_v14, %v1462_v16  ;;  %v1463_v2 = vmul.f32 %v3191_v28, %v632_v34 }
 0x19d   :  { %2548 = vmatprep.mubr.msk.f32.mxu1 %vm136_vm0, %v783_v59  ;;  %v655_v21 = vmul.f32 %v636_v11, %v3184_v4  ;;  %v1464_v13 = vmul.f32 %v3203_v32, %v633_v9  ;;  %2576 = vmatprep.mubr.msk.f32.mxu0 %vm136_vm0, %v1593_v61  ;;  %v656_v24 = vmul.f32 %v3199_v49, %v637_v20 }
 0x19e   :  { %v784_v3 = vcombine.low %v672_v62, %v673_v26  ;;  %v638_v27 = vmul.f32 %v600_v10, %v3150_v5  ;;  %v639_v25 = vmul.f32 %v607_v35, %v3153_v12  ;;  %v1594_v1 = vcombine.low %v1480_v60, %v1481_v63 }
 0x19f   :  { %v674_v22 = vadd.f32 %v655_v21, %v3188_v19  ;;  %v1482_v29 = vadd.f32 %v1463_v2, %v3195_v31  ;;  %v1483_v57 = vadd.f32 %v3214_v14, %v1464_v13  ;;  %v675_v23 = vadd.f32 %v3210_v50, %v656_v24 }
 0x1a0   :  { %2549 = vmatmul.mubr.msk.f32.gmra.mrb[4].mxu1 %vm136_vm0, %v784_v3  ;;  %v657_v38 = vmul.f32 %v638_v27, %v3184_v4  ;;  %v658_v39 = vmul.f32 %v3199_v49, %v639_v25  ;;  %v1465_v6 = vmul.f32 %v3191_v28, %v634_v46  ;;  %2577 = vmatmul.mubr.msk.f32.gmra.mrb[6].mxu0 %vm136_vm0, %v1594_v1 }
 0x1a1   :  { %v1595_v5 = vcombine.low %v1482_v29, %v1483_v57  ;;  %v1466_v12 = vmul.f32 %v3203_v32, %v635_v47  ;;  %v1467_v7 = vmul.f32 %v3191_v28, %v636_v11  ;;  %v1468_v18 = vmul.f32 %v3203_v32, %v637_v20 }
 0x1a2   :  { %v785_v58 = vcombine.low %v674_v22, %v675_v23  ;;  %v676_v30 = vadd.f32 %v657_v38, %v3188_v19  ;;  %v677_v42 = vadd.f32 %v3210_v50, %v658_v39  ;;  %v1484_v4 = vadd.f32 %v1465_v6, %v3195_v31 }
 0x1a3   :  { %2579 = vmatprep.mubr.msk.f32.mxu0 %vm136_vm0, %v1595_v5  ;;  %v1485_v49 = vadd.f32 %v3214_v14, %v1466_v12  ;;  %v1486_v33 = vadd.f32 %v1467_v7, %v3195_v31  ;;  %v1487_v34 = vadd.f32 %v3214_v14, %v1468_v18  ;;  %v1469_v9 = vmul.f32 %v3191_v28, %v638_v27  ;;  %v122_v28 = vld [vmem:[%s3904_s5] sm:$0x3] }
 0x1a4   :  { %2551 = vmatprep.mubr.msk.f32.mxu1 %vm136_vm0, %v785_v58  ;;  %v786_v10 = vcombine.low %v676_v30, %v677_v42  ;;  %v1470_v35 = vmul.f32 %v3203_v32, %v639_v25  ;;  %v3353_v32 = vrot.slane %v122_v28, %v3172_v56  ;;  %v3363_v15 = vrot.slane %v122_v28, %v3181_v0 }
 0x1a5   :  { %v1596_v19 = vcombine.low %v1484_v4, %v1485_v49  ;;  %v1488_v50 = vadd.f32 %v1469_v9, %v3195_v31  ;;  %v1597_v37 = vcombine.low %v1486_v33, %v1487_v34  ;;  %v123_v31 = vld [vmem:[%s3905_s6] sm:$0x3]  ;;  %v3372_v59 = vrot.slane %v124_v53, %v3172_v56 }
 0x1a6   :  { %2552 = vmatmul.mubr.msk.f32.gmra.mrb[6].mxu1 %vm136_vm0, %v786_v10  ;;  %v1489_v40 = vadd.f32 %v3214_v14, %v1470_v35  ;;  %v935_v14 = vrot.slane %v123_v31, %v3172_v56  ;;  %v1747_v52 = vrot.slane %v123_v31, %v3181_v0  ;;  %v3416_v7 = vrot.slane %v124_v53, %v3181_v0 }
 0x1a7   :  { %2580 = vmatmul.mubr.msk.f32.gmra.mrb[8].mxu0 %vm136_vm0, %v1596_v19 }
 0x1a8   :  { %2582 = vmatprep.mubr.msk.f32.mxu0 %vm136_vm0, %v1597_v37  ;;  %v1598_v43 = vcombine.low %v1488_v50, %v1489_v40 }
 0x1ab   :  { %2583 = vmatmul.mubr.msk.f32.gmra.mrb[10].mxu0 %vm136_vm0, %v1598_v43  ;;  %v125_v43 = vld [vmem:[%s3907_s8] sm:$0x3] }
 0x1ac   :  { %2657 = vpush %v125_v43 }
 0x1dd   :  { %s3631_s8 = spop %2657 }
 0x25b   :  { %v2533_v48 = vpop.f32.mrb[0].mxu0 }
 0x25c   :  { %v760_v8 = vadd.f32 %v2533_v48, %v3353_v32  ;;  %v754_v44 = vpop.f32.mrb[1].mxu0 }
 0x25d   :  { %v755_v45 = vadd.f32 %v754_v44, %v3353_v32 }
 0x25e   :  { %v3358_v46 = vmul.f32 %v935_v14, %v760_v8 }
 0x25f   :  { %v3360_v47 = vmul.f32 %v935_v14, %v755_v45 }
 0x263   :  { %v2564_v55 = vpop.f32.mrb[2].mxu0 }
 0x264   :  { %v1572_v51 = vadd.f32 %v2564_v55, %v3363_v15  ;;  %v1566_v17 = vpop.f32.mrb[3].mxu0 }
 0x265   :  { %v1567_v54 = vadd.f32 %v1566_v17, %v3363_v15 }
 0x266   :  { %v1749_v60 = vmul.f32 %v1747_v52, %v1572_v51 }
 0x267   :  { %v1748_v62 = vmul.f32 %v1747_v52, %v1567_v54 }
 0x268   :  { %v2544_v16 = vpop.f32.mrb[0].mxu1  ;;  %v1753_v20 = vsel %vm136_vm0, %v1749_v60, 0.0 }
 0x269   :  { %v3375_v11 = vadd.f32 %v2544_v16, %v3353_v32  ;;  %v869_v61 = vpop.f32.mrb[1].mxu1  ;;  %1754 = vadd.xlane.f32.xlu0 %v1753_v20  ;;  %v1750_v63 = vsel %vm136_vm0, %v1748_v62, 0.0 }
 0x26a   :  { %v3378_v26 = vadd.f32 %v869_v61, %v3353_v32  ;;  %1751 = vadd.xlane.f32.xlu1 %v1750_v63 }
 0x26b   :  { %v950_v21 = vmul.f32 %v3372_v59, %v3375_v11  ;;  %v3400_v57 = vcombine.high %v3375_v11, %v3375_v11 }
 0x26c   :  { %v3386_v2 = vcombine.high %v3378_v26, %v3378_v26  ;;  %v2575_v3 = vpop.f32.mrb[4].mxu0  ;;  %v948_v29 = vmul.f32 %v3372_v59, %v3378_v26 }
 0x26d   :  { %v3388_v13 = vpop.f32.mrb[2].mxu1  ;;  %v971_v24 = vsel %vm964_vm1, %v950_v21, 0.0  ;;  %v3392_v25 = vadd.f32 %v2575_v3, %v3363_v15  ;;  %v1681_v1 = vpop.f32.mrb[5].mxu0  ;;  %v951_v12 = vmul.f32 %v3372_v59, %v3400_v57  ;;  %v1438_v3 = vrot.slane %v125_v43, 1 }
 0x26e   :  { %v879_v27 = vpop.f32.mrb[3].mxu1  ;;  %v949_v22 = vmul.f32 %v3372_v59, %v3386_v2  ;;  %972 = vadd.xlane.f32.xlu0 %v971_v24  ;;  %v965_v5 = vsel %vm964_vm1, %v948_v29, 0.0  ;;  %v3419_v58 = vadd.f32 %v1681_v1, %v3363_v15 }
 0x26f   :  { %v3403_v23 = vadd.f32 %v879_v27, %v3353_v32  ;;  %v3408_v39 = vcombine.high %v3392_v25, %v3392_v25  ;;  %v974_v10 = vsel %vm964_vm1, %v951_v12, 0.0  ;;  %v1762_v35 = vmul.f32 %v3416_v7, %v3392_v25  ;;  %2659 = vpush %v1438_v3 }
 0x270   :  { %v968_v38 = vsel %vm964_vm1, %v949_v22, 0.0  ;;  %v3439_v37 = vcombine.high %v3419_v58, %v3419_v58  ;;  %v1760_v8 = vmul.f32 %v3416_v7, %v3419_v58 }
 0x271   :  { %969 = vadd.xlane.f32.xlu1 %v968_v38  ;;  %v952_v6 = vmul.f32 %v3372_v59, %v3403_v23  ;;  %v1763_v49 = vmul.f32 %v3416_v7, %v3408_v39  ;;  %v3426_v33 = vcombine.high %v3403_v23, %v3403_v23  ;;  %v1782_v48 = vsel %vm964_vm1, %v1762_v35, 0.0 }
 0x272   :  { %966 = vadd.xlane.f32.xlu0 %v965_v5  ;;  %v1761_v53 = vmul.f32 %v3416_v7, %v3439_v37  ;;  %v1776_v51 = vsel %vm964_vm1, %v1760_v8, 0.0 }
 0x273   :  { %v2550_v18 = vpop.f32.mrb[4].mxu1  ;;  %v2578_v42 = vpop.f32.mrb[6].mxu0  ;;  %v977_v4 = vsel %vm964_vm1, %v952_v6, 0.0  ;;  %v1785_v19 = vsel %vm964_vm1, %v1763_v49, 0.0  ;;  %v953_v50 = vmul.f32 %v3372_v59, %v3426_v33 }
 0x274   :  { %v889_v30 = vpop.f32.mrb[5].mxu1  ;;  %v1691_v34 = vpop.f32.mrb[7].mxu0  ;;  %v3429_v9 = vadd.f32 %v2550_v18, %v3353_v32  ;;  %v3467_v60 = vadd.f32 %v2578_v42, %v3363_v15  ;;  %v1779_v61 = vsel %vm964_vm1, %v1761_v53, 0.0 }
 0x275   :  { %978 = vadd.xlane.f32.xlu1 %v977_v4  ;;  %v3447_v28 = vadd.f32 %v889_v30, %v3353_v32  ;;  %v980_v52 = vsel %vm964_vm1, %v953_v50, 0.0  ;;  %v3488_v38 = vadd.f32 %v1691_v34, %v3363_v15 }
 0x276   :  { %975 = vadd.xlane.f32.xlu0 %v974_v10  ;;  %v3454_v44 = vcombine.high %v3429_v9, %v3429_v9  ;;  %v958_v62 = vmul.f32 %v3372_v59, %v3429_v9  ;;  %v1766_v27 = vmul.f32 %v3416_v7, %v3467_v60  ;;  %v3508_v34 = vcombine.high %v3467_v60, %v3467_v60 }
 0x277   :  { %v3464_v54 = vcombine.high %v3447_v28, %v3447_v28  ;;  %v956_v5 = vmul.f32 %v3372_v59, %v3447_v28  ;;  %v1764_v49 = vmul.f32 %v3416_v7, %v3488_v38 }
 0x278   :  { %v959_v17 = vmul.f32 %v3372_v59, %v3454_v44  ;;  %v995_v24 = vsel %vm964_vm1, %v958_v62, 0.0  ;;  %v1794_v6 = vsel %vm964_vm1, %v1766_v27, 0.0  ;;  %v1767_v43 = vmul.f32 %v3416_v7, %v3508_v34 }
 0x279   :  { %v3441_v40 = vpop.f32.mrb[6].mxu1  ;;  %1786 = vadd.xlane.f32.xlu1 %v1785_v19  ;;  %v957_v21 = vmul.f32 %v3372_v59, %v3464_v54  ;;  %v989_v4 = vsel %vm964_vm1, %v956_v5, 0.0  ;;  %v1788_v50 = vsel %vm964_vm1, %v1764_v49, 0.0 }
 0x27a   :  { %v899_v31 = vpop.f32.mrb[7].mxu1  ;;  %v2581_v14 = vpop.f32.mrb[8].mxu0  ;;  %1783 = vadd.xlane.f32.xlu0 %v1782_v48  ;;  %v998_v63 = vsel %vm964_vm1, %v959_v17, 0.0  ;;  %v3541_v17 = vadd.f32 %v3388_v13, %v3353_v32 }
 0x27b   :  { %v1701_v45 = vpop.f32.mrb[9].mxu0  ;;  %v3473_v20 = vadd.f32 %v2581_v14, %v3363_v15  ;;  %v3482_v1 = vadd.f32 %v899_v31, %v3353_v32  ;;  %v992_v22 = vsel %vm964_vm1, %v957_v21, 0.0  ;;  %v3522_v31 = vcombine.high %v3488_v38, %v3488_v38 }
 0x27c   :  { %v3494_v12 = vadd.f32 %v1701_v45, %v3363_v15  ;;  %v1797_v45 = vsel %vm964_vm1, %v1767_v43, 0.0  ;;  %v954_v13 = vmul.f32 %v3372_v59, %v3541_v17 }
 0x27d   :  { %981 = vadd.xlane.f32.xlu1 %v980_v52  ;;  %v1770_v29 = vmul.f32 %v3416_v7, %v3473_v20  ;;  %v960_v30 = vmul.f32 %v3372_v59, %v3482_v1  ;;  %v3501_v42 = vcombine.high %v3473_v20, %v3473_v20  ;;  %v1765_v52 = vmul.f32 %v3416_v7, %v3522_v31 }
 0x27e   :  { %v2584_v55 = vpop.f32.mrb[10].mxu0  ;;  %1777 = vadd.xlane.f32.xlu0 %v1776_v51  ;;  %v3515_v19 = vcombine.high %v3494_v12, %v3494_v12  ;;  %v1768_v62 = vmul.f32 %v3416_v7, %v3494_v12 }
 0x27f   :  { %v1711_v16 = vpop.f32.mrb[11].mxu0  ;;  %v1806_v18 = vsel %vm964_vm1, %v1770_v29, 0.0  ;;  %v1001_v10 = vsel %vm964_vm1, %v960_v30, 0.0  ;;  %v1771_v35 = vmul.f32 %v3416_v7, %v3501_v42  ;;  %v3525_v14 = vadd.f32 %v2584_v55, %v3363_v15 }
 0x280   :  { %v1769_v8 = vmul.f32 %v3416_v7, %v3515_v19  ;;  %v3534_v53 = vadd.f32 %v1711_v16, %v3363_v15  ;;  %v1800_v21 = vsel %vm964_vm1, %v1768_v62, 0.0  ;;  %v3569_v29 = vadd.f32 %v3441_v40, %v3353_v32 }
 0x281   :  { %1780 = vadd.xlane.f32.xlu1 %v1779_v61  ;;  %v1809_v48 = vsel %vm964_vm1, %v1771_v35, 0.0  ;;  %v1774_v55 = vmul.f32 %v3416_v7, %v3525_v14  ;;  %v1791_v61 = vsel %vm964_vm1, %v1765_v52, 0.0  ;;  %v3558_v3 = vcombine.high %v3525_v14, %v3525_v14 }
 0x282   :  { %999 = vadd.xlane.f32.xlu0 %v998_v63  ;;  %v1803_v51 = vsel %vm964_vm1, %v1769_v8, 0.0  ;;  %v1772_v15 = vmul.f32 %v3416_v7, %v3534_v53  ;;  %v3551_v16 = vcombine.high %v3534_v53, %v3534_v53  ;;  %3918 = vst [vmem:[#allocation17_spill] sm:$0xff] %v3569_v29  ;;  %v3586_v40 = vcombine.high %v3569_v29, %v3569_v29 }
 0x283   :  { %v1818_v63 = vsel %vm964_vm1, %v1774_v55, 0.0  ;;  %3916 = vst [vmem:[#allocation15_spill] sm:$0xff] %v3558_v3  ;;  %v1775_v5 = vmul.f32 %v3416_v7, %v3558_v3  ;;  %v938_v8 = vsel %vm136_vm0, %v3360_v47, 0.0 }
 0x284   :  { %v1773_v27 = vmul.f32 %v3416_v7, %v3551_v16  ;;  %3920 = vst [vmem:[#allocation19_spill] sm:$0xff] %v3586_v40 }
 0x285   :  { %996 = vadd.xlane.f32.xlu1 %v995_v24  ;;  %v1812_v24 = vsel %vm964_vm1, %v1772_v15, 0.0  ;;  %v1821_v49 = vsel %vm964_vm1, %v1775_v5, 0.0 }
 0x286   :  { %993 = vadd.xlane.f32.xlu0 %v992_v22  ;;  %v3565_v22 = vcombine.high %v3482_v1, %v3482_v1  ;;  %v1815_v30 = vsel %vm964_vm1, %v1773_v27, 0.0 }
 0x288   :  { %3917 = vst [vmem:[#allocation16_spill] sm:$0xff] %v3565_v22 }
 0x289   :  { %1795 = vadd.xlane.f32.xlu1 %v1794_v6  ;;  %v983_v6 = vsel %vm964_vm1, %v954_v13, 0.0 }
 0x28a   :  { %1807 = vadd.xlane.f32.xlu0 %v1806_v18  ;;  %v3576_v18 = vcombine.high %v3541_v17, %v3541_v17 }
 0x28c   :  { %3919 = vst [vmem:[#allocation18_spill] sm:$0xff] %v3576_v18  ;;  %v955_v32 = vmul.f32 %v3372_v59, %v3576_v18 }
 0x28d   :  { %990 = vadd.xlane.f32.xlu1 %v989_v4  ;;  %v961_v4 = vmul.f32 %v3372_v59, %v3565_v22 }
 0x28e   :  { %1002 = vadd.xlane.f32.xlu0 %v1001_v10  ;;  %v962_v10 = vmul.f32 %v3372_v59, %v3569_v29  ;;  %v986_v35 = vsel %vm964_vm1, %v955_v32, 0.0 }
 0x28f   :  { %v1004_v7 = vsel %vm964_vm1, %v961_v4, 0.0 }
 0x290   :  { %v1007_v43 = vsel %vm964_vm1, %v962_v10, 0.0 }
 0x291   :  { %1789 = vadd.xlane.f32.xlu1 %v1788_v50  ;;  %v963_v50 = vmul.f32 %v3372_v59, %v3586_v40 }
 0x292   :  { %1810 = vadd.xlane.f32.xlu0 %v1809_v48 }
 0x293   :  { %v1010_v48 = vsel %vm964_vm1, %v963_v50, 0.0 }
 0x295   :  { %1798 = vadd.xlane.f32.xlu1 %v1797_v45  ;;  %v941_v45 = vsel %vm136_vm0, %v3358_v46, 0.0 }
 0x296   :  { %1804 = vadd.xlane.f32.xlu0 %v1803_v51 }
 0x299   :  { %1792 = vadd.xlane.f32.xlu1 %v1791_v61 }
 0x29a   :  { %1819 = vadd.xlane.f32.xlu0 %v1818_v63 }
 0x29d   :  { %1801 = vadd.xlane.f32.xlu1 %v1800_v21 }
 0x29e   :  { %1813 = vadd.xlane.f32.xlu0 %v1812_v24 }
 0x2a0   :  { %s3637_s17 = spop %2659 }
 0x2a1   :  { %984 = vadd.xlane.f32.xlu1 %v983_v6  ;;  %v1922_v29 = vstv %s3637_s17 }
 0x2a2   :  { %1816 = vadd.xlane.f32.xlu0 %v1815_v30  ;;  %v1030_v30 = vand.u32 127, %v164_v36 }
 0x2a4   :  { %v3620_v32 = vsub.s32 %v1030_v30, %v3045_v41 }
 0x2a5   :  { %1822 = vadd.xlane.f32.xlu1 %v1821_v49 }
 0x2a6   :  { %1005 = vadd.xlane.f32.xlu0 %v1004_v7 }
 0x2a9   :  { %987 = vadd.xlane.f32.xlu1 %v986_v35 }
 0x2aa   :  { %1008 = vadd.xlane.f32.xlu0 %v1007_v43 }
 0x2ad   :  { %1011 = vadd.xlane.f32.xlu1 %v1010_v48 }
 0x2ae   :  { %939 = vadd.xlane.f32.xlu0 %v938_v8 }
 0x2b1   :  { %942 = vadd.xlane.f32.xlu1 %v941_v45 }
 0x2f6   :  { %v3600_v52 = vpop.xlane.xlu0 %1754 }
 0x2f7   :  { %v1752_v51 = vpop.xlane.xlu1 %1751 }
 0x2fb   :  { %v3602_v55 = vpop.xlane.xlu0 %972 }
 0x2fe   :  { %v3604_v59 = vpop.xlane.xlu1 %969 }
 0x2ff   :  { %v3606_v61 = vpop.xlane.xlu0 %966 }
 0x302   :  { %v3608_v62 = vpop.xlane.xlu1 %978 }
 0x303   :  { %v3610_v63 = vpop.xlane.xlu0 %975 }
 0x306   :  { %v1787_v15 = vpop.xlane.xlu1 %1786 }
 0x307   :  { %v1784_v47 = vpop.xlane.xlu0 %1783  ;;  %v1855_v18 = vrot.slane %v1787_v15, %v3620_v32 }
 0x308   :  { %v1851_v8 = vrot.slane %v1784_v47, %v3620_v32 }
 0x30a   :  { %v3612_v21 = vpop.xlane.xlu1 %981 }
 0x30b   :  { %v1778_v13 = vpop.xlane.xlu0 %1777 }
 0x30c   :  { %v1843_v50 = vrot.slane %v1778_v13, %v3620_v32 }
 0x30e   :  { %v1781_v46 = vpop.xlane.xlu1 %1780 }
 0x30f   :  { %v3614_v24 = vpop.xlane.xlu0 %999  ;;  %v1847_v10 = vrot.slane %v1781_v46, %v3620_v32 }
 0x311   :  { %v1904_v48 = vsel %vm1095_vm2, %v1847_v10, %v1843_v50 }
 0x312   :  { %v3616_v27 = vpop.xlane.xlu1 %996  ;;  %v1905_v36 = vsel %vm1097_vm3, %v1851_v8, %v1904_v48 }
 0x313   :  { %v994_v6 = vpop.xlane.xlu0 %993  ;;  %v1906_v13 = vsel %vm1099_vm4, %v1855_v18, %v1905_v36 }
 0x316   :  { %v1796_v5 = vpop.xlane.xlu1 %1795 }
 0x317   :  { %v1808_v4 = vpop.xlane.xlu0 %1807  ;;  %v1867_v47 = vrot.slane %v1796_v5, %v3620_v32 }
 0x31a   :  { %v991_v49 = vpop.xlane.xlu1 %990 }
 0x31b   :  { %v3622_v7 = vpop.xlane.xlu0 %1002 }
 0x31e   :  { %v1790_v35 = vpop.xlane.xlu1 %1789 }
 0x31f   :  { %v1811_v43 = vpop.xlane.xlu0 %1810  ;;  %v1859_v30 = vrot.slane %v1790_v35, %v3620_v32 }
 0x321   :  { %v1907_v50 = vsel %vm1101_vm5, %v1859_v30, %v1906_v13  ;;  %v1883_v30 = vrot.slane %v1808_v4, %v3620_v32  ;;  %v1066_v13 = vrot.slane %v991_v49, %v3620_v32 }
 0x322   :  { %v1799_v45 = vpop.xlane.xlu1 %1798 }
 0x323   :  { %v1805_v40 = vpop.xlane.xlu0 %1804  ;;  %v1871_v15 = vrot.slane %v1799_v45, %v3620_v32  ;;  %v1034_v45 = vrot.slane %v3606_v61, %v3620_v32 }
 0x324   :  { %v1879_v36 = vrot.slane %v1805_v40, %v3620_v32  ;;  %v1070_v40 = vrot.slane %v994_v6, %v3620_v32 }
 0x326   :  { %v1793_v46 = vpop.xlane.xlu1 %1792  ;;  %v1109_v61 = vsel %vm1095_vm2, %v1070_v40, %v1066_v13 }
 0x327   :  { %v1863_v10 = vrot.slane %v1793_v46, %v3620_v32  ;;  %v1820_v48 = vpop.xlane.xlu0 %1819 }
 0x329   :  { %v1908_v35 = vsel %vm1103_vm7, %v1863_v10, %v1907_v50  ;;  %v1887_v10 = vrot.slane %v1811_v43, %v3620_v32 }
 0x32a   :  { %v1802_v8 = vpop.xlane.xlu1 %1801  ;;  %v1909_v18 = vsel %vm1105_vm6, %v1867_v47, %v1908_v35 }
 0x32b   :  { %v1875_v46 = vrot.slane %v1802_v8, %v3620_v32  ;;  %v1910_v5 = vsel %vm1107_vm8, %v1871_v15, %v1909_v18  ;;  %v1814_v22 = vpop.xlane.xlu0 %1813 }
 0x32c   :  { %v1920_v3 = vadd.f32 %v1910_v5, %v1752_v51  ;;  %v1891_v4 = vrot.slane %v1814_v22, %v3620_v32  ;;  %v1038_v51 = vrot.slane %v3604_v59, %v3620_v32  ;;  %v1074_v22 = vrot.slane %v3616_v27, %v3620_v32 }
 0x32d   :  { %v1911_v47 = vsel %vm1095_vm2, %v1879_v36, %v1875_v46  ;;  %v1042_v59 = vrot.slane %v3602_v55, %v3620_v32  ;;  %v1899_v36 = vrot.slane %v1820_v48, %v3620_v32  ;;  %v1078_v27 = vrot.slane %v3614_v24, %v3620_v32 }
 0x32e   :  { %v1912_v50 = vsel %vm1097_vm3, %v1883_v30, %v1911_v47  ;;  %v3654_v15 = vadd.f32 %v1922_v29, %v1920_v3  ;;  %v985_v35 = vpop.xlane.xlu1 %984  ;;  %v1096_v6 = vsel %vm1095_vm2, %v1038_v51, %v1034_v45  ;;  %v1046_v3 = vrot.slane %v3610_v63, %v3620_v32 }
 0x32f   :  { %v1913_v49 = vsel %vm1099_vm4, %v1887_v10, %v1912_v50  ;;  %v1817_v43 = vpop.xlane.xlu0 %1816  ;;  %v1110_v30 = vsel %vm1097_vm3, %v1074_v22, %v1109_v61  ;;  %v1098_v45 = vsel %vm1097_vm3, %v1042_v59, %v1096_v6  ;;  %v1082_v48 = vrot.slane %v3622_v7, %v3620_v32 }
 0x330   :  { %v1925_v8 = vsel %vm1123_vm9, %v3654_v15, -inf  ;;  %v1895_v18 = vrot.slane %v1817_v43, %v3620_v32  ;;  %v1914_v46 = vsel %vm1101_vm5, %v1891_v4, %v1913_v49  ;;  %v1100_v55 = vsel %vm1099_vm4, %v1046_v3, %v1098_v45 }
 0x331   :  { %1926 = vmax.xlane.f32.xlu0 %v1925_v8  ;;  %v1054_v50 = vrot.slane %v3612_v21, %v3620_v32  ;;  %v1111_v4 = vsel %vm1099_vm4, %v1078_v27, %v1110_v30  ;;  %v1050_v61 = vrot.slane %v3608_v62, %v3620_v32  ;;  %v1058_v43 = vrot.slane %v985_v35, %v3620_v32 }
 0x332   :  { %v1823_v5 = vpop.xlane.xlu1 %1822  ;;  %v1915_v13 = vsel %vm1103_vm7, %v1895_v18, %v1914_v46  ;;  %v1112_v21 = vsel %vm1101_vm5, %v1082_v48, %v1111_v4 }
 0x333   :  { %v1903_v63 = vrot.slane %v1823_v5, %v3620_v32  ;;  %v1916_v10 = vsel %vm1105_vm6, %v1899_v36, %v1915_v13  ;;  %v1006_v47 = vpop.xlane.xlu0 %1005  ;;  %v1102_v3 = vsel %vm1101_vm5, %v1050_v61, %v1100_v55 }
 0x334   :  { %v1086_v51 = vrot.slane %v1006_v47, %v3620_v32  ;;  %v1104_v18 = vsel %vm1103_vm7, %v1054_v50, %v1102_v3 }
 0x335   :  { %v1917_v40 = vsel %vm1107_vm8, %v1903_v63, %v1916_v10  ;;  %v1106_v36 = vsel %vm1105_vm6, %v1058_v43, %v1104_v18  ;;  %v1120_v63 = vstv %s3631_s8 }
 0x336   :  { %v988_v49 = vpop.xlane.xlu1 %987  ;;  %v1921_v24 = vadd.f32 %v1917_v40, %v3600_v52  ;;  %v1113_v52 = vsel %vm1103_vm7, %v1086_v51, %v1112_v21 }
 0x337   :  { %v1062_v8 = vrot.slane %v988_v49, %v3620_v32  ;;  %v1009_v7 = vpop.xlane.xlu0 %1008 }
 0x338   :  { %v1924_v6 = vadd.f32 %v1922_v29, %v1921_v24  ;;  %v1090_v22 = vrot.slane %v1009_v7, %v3620_v32 }
 0x339   :  { %v1108_v46 = vsel %vm1107_vm8, %v1062_v8, %v1106_v36 }
 0x33a   :  { %v1012_v59 = vpop.xlane.xlu1 %1011  ;;  %v1928_v62 = vsel %vm1123_vm9, %v1924_v6, -inf  ;;  %v1114_v29 = vsel %vm1105_vm6, %v1090_v22, %v1113_v52 }
 0x33b   :  { %v1094_v35 = vrot.slane %v1012_v59, %v3620_v32  ;;  %1929 = vmax.xlane.f32.xlu1 %v1928_v62  ;;  %v940_v5 = vpop.xlane.xlu0 %939 }
 0x33c   :  { %v1118_v30 = vadd.f32 %v1108_v46, %v940_v5 }
 0x33d   :  { %v1115_v13 = vsel %vm1107_vm8, %v1094_v35, %v1114_v29 }
 0x33e   :  { %v943_v45 = vpop.xlane.xlu1 %942  ;;  %v1121_v10 = vadd.f32 %v1120_v63, %v1118_v30 }
 0x33f   :  { %v1119_v27 = vadd.f32 %v1115_v13, %v943_v45 }
 0x340   :  { %v1124_v47 = vsel %vm1123_vm9, %v1121_v10, -inf }
 0x341   :  { %v1122_v55 = vadd.f32 %v1120_v63, %v1119_v27  ;;  %1125 = vmax.xlane.f32.xlu0 %v1124_v47  ;;  %v1169_v27 = vsub.s32 3, %v3045_v41 }
 0x343   :  { %v1127_v32 = vsel %vm1123_vm9, %v1122_v55, -inf }
 0x344   :  { %1128 = vmax.xlane.f32.xlu1 %v1127_v32 }
 0x3be   :  { %v1927_v48 = vpop.xlane.xlu0 %1926 }
 0x3bf   :  { %v1931_v40 = vsub.f32 %v3654_v15, %v1927_v48 }
 0x3c1   :  { %v1933_v50 = vmul.f32 1.442695, %v1931_v40  ;;  %v1176_v40 = vsub.s32 4, %v3045_v41 }
 0x3c3   :  { %2700 = vpow2.f32 %v1933_v50 }
 0x3c8   :  { %v1930_v4 = vpop.xlane.xlu1 %1929 }
 0x3c9   :  { %v1932_v51 = vsub.f32 %v1924_v6, %v1930_v4 }
 0x3cb   :  { %v1935_v49 = vmul.f32 1.442695, %v1932_v51 }
 0x3cd   :  { %v2701_v24 = vpop.eup %2700  ;;  %2702 = vpow2.f32 %v1935_v49  ;;  %v1183_v49 = vsub.s32 5, %v3045_v41 }
 0x3ce   :  { %v1937_v61 = vsel %vm1123_vm9, %v2701_v24, 0.0  ;;  %v1126_v43 = vpop.xlane.xlu0 %1125 }
 0x3cf   :  { %1938 = vadd.xlane.f32.xlu0 %v1937_v61  ;;  %v1130_v8 = vsub.f32 %v1121_v10, %v1126_v43  ;;  %v1162_v10 = vsub.s32 2, %v3045_v41 }
 0x3d1   :  { %v1129_v7 = vpop.xlane.xlu1 %1128  ;;  %v1132_v3 = vmul.f32 1.442695, %v1130_v8 }
 0x3d2   :  { %v1131_v21 = vsub.f32 %v1122_v55, %v1129_v7 }
 0x3d3   :  { %2704 = vpow2.f32 %v1132_v3 }
 0x3d4   :  { %v1134_v22 = vmul.f32 1.442695, %v1131_v21 }
 0x3d6   :  { %2706 = vpow2.f32 %v1134_v22 }
 0x3d7   :  { %v2703_v18 = vpop.eup %2702 }
 0x3d8   :  { %v1940_v15 = vsel %vm1123_vm9, %v2703_v18, 0.0 }
 0x3d9   :  { %1941 = vadd.xlane.f32.xlu1 %v1940_v15 }
 0x3dd   :  { %v2705_v52 = vpop.eup %2704 }
 0x3de   :  { %v1136_v6 = vsel %vm1123_vm9, %v2705_v52, 0.0 }
 0x3df   :  { %1137 = vadd.xlane.f32.xlu0 %v1136_v6 }
 0x3e0   :  { %v2707_v59 = vpop.eup %2706 }
 0x3e1   :  { %v1139_v62 = vsel %vm1123_vm9, %v2707_v59, 0.0 }
 0x3e2   :  { %1140 = vadd.xlane.f32.xlu1 %v1139_v62 }
 0x45c   :  { %v1939_v35 = vpop.xlane.xlu0 %1938 }
 0x466   :  { %v1942_v29 = vpop.xlane.xlu1 %1941 }
 0x46c   :  { %v1138_v36 = vpop.xlane.xlu0 %1137 }
 0x46d   :  { %2708 = vrcp.f32 %v1138_v36  ;;  %v1190_v36 = vsub.s32 6, %v3045_v41 }
 0x46e   :  { %2710 = vrcp.f32 %v1939_v35 }
 0x46f   :  { %v1141_v46 = vpop.xlane.xlu1 %1140 }
 0x470   :  { %2712 = vrcp.f32 %v1141_v46 }
 0x471   :  { %2714 = vrcp.f32 %v1942_v29 }
 0x477   :  { %v2709_v5 = vpop.eup %2708 }
 0x478   :  { %v3712_v30 = vmul.f32 %v2709_v5, %v2705_v52  ;;  %v2711_v45 = vpop.eup %2710  ;;  %v1197_v5 = vsub.s32 7, %v3045_v41 }
 0x479   :  { %v1945_v47 = vmul.f32 %v2711_v45, %v2701_v24 }
 0x47a   :  { %v1156_v13 = vrot.slane %v3712_v30, %v3181_v0  ;;  %v1149_v63 = vrot.slane %v3712_v30, %v3172_v56  ;;  %v1170_v55 = vrot.slane %v3712_v30, %v1169_v27  ;;  %v1163_v32 = vrot.slane %v3712_v30, %v1162_v10  ;;  %v2713_v48 = vpop.eup %2712 }
 0x47b   :  { %v1145_v50 = vmul.f32 %v2713_v48, %v2707_v59  ;;  %v1177_v4 = vrot.slane %v3712_v30, %v1176_v40  ;;  %v1950_v51 = vrot.slane %v1945_v47, %v3172_v56  ;;  %v1184_v24 = vrot.slane %v3712_v30, %v1183_v49  ;;  %v2715_v21 = vpop.eup %2714 }
 0x47c   :  { %1158 = vbcast.lane.b32.xlu1 %v1156_v13, 256  ;;  %1151 = vbcast.lane.b32.xlu0 %v1149_v63, 256  ;;  %v1957_v43 = vrot.slane %v1945_v47, %v3181_v0  ;;  %v1964_v7 = vrot.slane %v1945_v47, %v1162_v10  ;;  %v1946_v22 = vmul.f32 %v2715_v21, %v2703_v18 }
 0x47d   :  { %v1212_v61 = vrot.slane %v1145_v50, %v3181_v0  ;;  %v1219_v8 = vrot.slane %v1145_v50, %v1162_v10  ;;  %v1226_v3 = vrot.slane %v1145_v50, %v1169_v27  ;;  %v1971_v15 = vrot.slane %v1945_v47, %v1169_v27 }
 0x47e   :  { %v1233_v52 = vrot.slane %v1145_v50, %v1176_v40  ;;  %v1978_v6 = vrot.slane %v1945_v47, %v1176_v40  ;;  %v2013_v59 = vrot.slane %v1946_v22, %v3181_v0  ;;  %v1985_v62 = vrot.slane %v1945_v47, %v1183_v49 }
 0x47f   :  { %v2020_v35 = vrot.slane %v1946_v22, %v1162_v10  ;;  %v1992_v29 = vrot.slane %v1945_v47, %v1190_v36  ;;  %v2027_v46 = vrot.slane %v1946_v22, %v1169_v27  ;;  %v1999_v18 = vrot.slane %v1945_v47, %v1197_v5 }
 0x480   :  { %1172 = vbcast.lane.b32.xlu1 %v1170_v55, 256  ;;  %1165 = vbcast.lane.b32.xlu0 %v1163_v32, 256  ;;  %v2034_v13 = vrot.slane %v1946_v22, %v1176_v40  ;;  %v1205_v0 = vrot.slane %v1145_v50, %v3172_v56  ;;  %v2041_v63 = vrot.slane %v1946_v22, %v1183_v49  ;;  %v130_v40 = vld [vmem:[#allocation8 + $0x20] sm:$0xff] }
 0x481   :  { %v2006_v45 = vrot.slane %v1946_v22, %v3172_v56  ;;  %v2048_v10 = vrot.slane %v1946_v22, %v1190_v36  ;;  %v1191_v27 = vrot.slane %v3712_v30, %v1190_v36  ;;  %v1240_v55 = vrot.slane %v1145_v50, %v1183_v49 }
 0x482   :  { %v2055_v41 = vrot.slane %v1946_v22, %v1197_v5  ;;  %v1247_v47 = vrot.slane %v1145_v50, %v1190_v36  ;;  %v1198_v32 = vrot.slane %v3712_v30, %v1197_v5  ;;  %v1254_v48 = vrot.slane %v1145_v50, %v1197_v5 }
 0x484   :  { %1179 = vbcast.lane.b32.xlu1 %v1177_v4, 256  ;;  %1952 = vbcast.lane.b32.xlu0 %v1950_v51, 256  ;;  %v131_v4 = vld [vmem:[#allocation8 + $0x28] sm:$0xff]  ;;  %v132_v51 = vld [vmem:[#allocation8 + $0x30] sm:$0xff] }
 0x485   :  { %v2639_v56 = vpack.c.bf16 %v131_v4, %v130_v40 }
 0x487   :  { %2640 = vmatprep.subr.bf16.mxu1 %v2639_v56 }
 0x488   :  { %1186 = vbcast.lane.b32.xlu1 %v1184_v24, 256  ;;  %1214 = vbcast.lane.b32.xlu0 %v1212_v61, 256  ;;  %v133_v24 = vld [vmem:[#allocation8 + $0x38] sm:$0xff]  ;;  %v126_v61 = vld [vmem:[#allocation8] sm:$0xff] }
 0x489   :  { %2642 = vmatpush3.bf16.msra.mxu1 %v2639_v56  ;;  %v2643_v49 = vpack.c.bf16 %v133_v24, %v132_v51 }
 0x48b   :  { %2644 = vmatprep.subr.bf16.mxu1 %v2643_v49 }
 0x48c   :  { %1959 = vbcast.lane.b32.xlu1 %v1957_v43, 256  ;;  %1221 = vbcast.lane.b32.xlu0 %v1219_v8, 256  ;;  %v127_v43 = vld [vmem:[#allocation8 + $0x8] sm:$0xff] }
 0x48d   :  { %v3736_v8 = vpack.c.bf16 %v127_v43, %v126_v61  ;;  %2646 = vmatpush3.bf16.msra.mxu1 %v2643_v49 }
 0x48f   :  { %2648 = vmatprep.subr.bf16.mxu1 %v3736_v8 }
 0x490   :  { %1966 = vbcast.lane.b32.xlu1 %v1964_v7, 256  ;;  %1228 = vbcast.lane.b32.xlu0 %v1226_v3, 256 }
 0x494   :  { %1973 = vbcast.lane.b32.xlu1 %v1971_v15, 256  ;;  %1235 = vbcast.lane.b32.xlu0 %v1233_v52, 256 }
 0x498   :  { %1980 = vbcast.lane.b32.xlu1 %v1978_v6, 256  ;;  %2015 = vbcast.lane.b32.xlu0 %v2013_v59, 256 }
 0x49c   :  { %1987 = vbcast.lane.b32.xlu1 %v1985_v62, 256  ;;  %2022 = vbcast.lane.b32.xlu0 %v2020_v35, 256 }
 0x4a0   :  { %1994 = vbcast.lane.b32.xlu1 %v1992_v29, 256  ;;  %2029 = vbcast.lane.b32.xlu0 %v2027_v46, 256 }
 0x4a4   :  { %2001 = vbcast.lane.b32.xlu1 %v1999_v18, 256  ;;  %2036 = vbcast.lane.b32.xlu0 %v2034_v13, 256 }
 0x4a8   :  { %1207 = vbcast.lane.b32.xlu1 %v1205_v0, 256  ;;  %2043 = vbcast.lane.b32.xlu0 %v2041_v63, 256 }
 0x4ac   :  { %2008 = vbcast.lane.b32.xlu1 %v2006_v45, 256  ;;  %2050 = vbcast.lane.b32.xlu0 %v2048_v10, 256 }
 0x4b0   :  { %1193 = vbcast.lane.b32.xlu1 %v1191_v27, 256  ;;  %1242 = vbcast.lane.b32.xlu0 %v1240_v55, 256 }
 0x4b4   :  { %2057 = vbcast.lane.b32.xlu1 %v2055_v41, 256  ;;  %1249 = vbcast.lane.b32.xlu0 %v1247_v47, 256 }
 0x4b8   :  { %1200 = vbcast.lane.b32.xlu1 %v1198_v32, 256 }
 0x4bc   :  { %1256 = vbcast.lane.b32.xlu1 %v1254_v48, 256 }
 0x4ee   :  { %v1159_v30 = vpop.permute.xlu1 %1158  ;;  %v1152_v7 = vpop.permute.xlu0 %1151 }
 0x4ef   :  { %v1259_v50 = vmul.f32 %v1159_v30, %v3386_v2  ;;  %v1258_v3 = vmul.f32 %v1152_v7, %v3378_v26 }
 0x4f1   :  { %v1281_v21 = vsel %vm964_vm1, %v1259_v50, 0.0  ;;  %v1274_v22 = vsel %vm964_vm1, %v1258_v3, 0.0 }
 0x4f2   :  { %v1282_v15 = vrot.slane %v1281_v21, 4  ;;  %v1275_v52 = vrot.slane %v1274_v22, 4  ;;  %v1173_v6 = vpop.permute.xlu1 %1172  ;;  %v1166_v59 = vpop.permute.xlu0 %1165 }
 0x4f3   :  { %v1261_v62 = vmul.f32 %v1173_v6, %v3400_v57  ;;  %v1260_v35 = vmul.f32 %v1166_v59, %v3375_v11 }
 0x4f4   :  { %v1283_v36 = vadd.f32 %v1282_v15, %v1281_v21  ;;  %v1276_v29 = vadd.f32 %v1275_v52, %v1274_v22 }
 0x4f5   :  { %v1295_v46 = vsel %vm964_vm1, %v1261_v62, 0.0  ;;  %v1288_v2 = vsel %vm964_vm1, %v1260_v35, 0.0 }
 0x4f6   :  { %v1284_v5 = vrot.slane %v1283_v36, 2  ;;  %v1277_v26 = vrot.slane %v1276_v29, 2  ;;  %v1296_v18 = vrot.slane %v1295_v46, 4  ;;  %v1289_v13 = vrot.slane %v1288_v2, 4  ;;  %v1180_v0 = vpop.permute.xlu1 %1179  ;;  %v1953_v63 = vpop.permute.xlu0 %1952 }
 0x4f7   :  { %v1262_v45 = vmul.f32 %v1180_v0, %v3403_v23  ;;  %v2059_v10 = vmul.f32 %v1953_v63, %v3419_v58 }
 0x4f8   :  { %v1297_v27 = vadd.f32 %v1296_v18, %v1295_v46  ;;  %v1290_v57 = vadd.f32 %v1289_v13, %v1288_v2  ;;  %v1285_v41 = vadd.f32 %v1284_v5, %v1283_v36  ;;  %v1278_v47 = vadd.f32 %v1277_v26, %v1276_v29 }
 0x4f9   :  { %v1302_v11 = vsel %vm964_vm1, %v1262_v45, 0.0  ;;  %v2075_v55 = vsel %vm964_vm1, %v2059_v10, 0.0 }
 0x4fa   :  { %v1298_v32 = vrot.slane %v1297_v27, 2  ;;  %v1291_v48 = vrot.slane %v1290_v57, 2  ;;  %v1187_v40 = vpop.permute.xlu1 %1186  ;;  %v1215_v4 = vpop.permute.xlu0 %1214  ;;  %v1303_v56 = vrot.slane %v1302_v11, 4  ;;  %v2076_v51 = vrot.slane %v2075_v55, 4 }
 0x4fb   :  { %v1263_v24 = vmul.f32 %v1187_v40, %v3426_v33  ;;  %v1267_v23 = vmul.f32 %v1215_v4, %v3464_v54  ;;  %v1286_v30 = vrot.slane %v1285_v41, 1  ;;  %v1279_v7 = vrot.slane %v1278_v47, 1 }
 0x4fc   :  { %v1292_v61 = vadd.f32 %v1291_v48, %v1290_v57  ;;  %v1304_v58 = vadd.f32 %v1303_v56, %v1302_v11  ;;  %v2077_v49 = vadd.f32 %v2076_v51, %v2075_v55  ;;  %v1299_v15 = vadd.f32 %v1298_v32, %v1297_v27 }
 0x4fd   :  { %v1309_v43 = vsel %vm964_vm1, %v1263_v24, 0.0  ;;  %v1337_v3 = vsel %vm964_vm1, %v1267_v23, 0.0  ;;  %v1287_v36 = vadd.f32 %v1286_v30, %v1285_v41  ;;  %v1280_v18 = vadd.f32 %v1279_v7, %v1278_v47 }
 0x4fe   :  { %v1310_v50 = vrot.slane %v1309_v43, 4  ;;  %v1960_v21 = vpop.permute.xlu1 %1959  ;;  %v1222_v22 = vpop.permute.xlu0 %1221  ;;  %v1293_v52 = vrot.slane %v1292_v61, 1  ;;  %v1305_v6 = vrot.slane %v1304_v58, 2  ;;  %v2078_v33 = vrot.slane %v2077_v49, 2 }
 0x4ff   :  { %v2060_v59 = vmul.f32 %v1960_v21, %v3439_v37  ;;  %v1268_v54 = vmul.f32 %v1222_v22, %v3429_v9  ;;  %v1338_v62 = vrot.slane %v1337_v3, 4  ;;  %v1300_v13 = vrot.slane %v1299_v15, 1 }
 0x500   :  { %v1311_v29 = vadd.f32 %v1310_v50, %v1309_v43  ;;  %v1294_v0 = vadd.f32 %v1293_v52, %v1292_v61  ;;  %v1306_v63 = vadd.f32 %v1305_v6, %v1304_v58  ;;  %v2079_v45 = vadd.f32 %v2078_v33, %v2077_v49 }
 0x501   :  { %v2082_v35 = vsel %vm964_vm1, %v2060_v59, 0.0  ;;  %v1344_v2 = vsel %vm964_vm1, %v1268_v54, 0.0  ;;  %v1339_v9 = vadd.f32 %v1338_v62, %v1337_v3  ;;  %v1402_v40 = vsel %vm1095_vm2, %v1287_v36, %v1280_v18 }
 0x502   :  { %v2083_v46 = vrot.slane %v2082_v35, 4  ;;  %v1967_v5 = vpop.permute.xlu1 %1966  ;;  %v1229_v26 = vpop.permute.xlu0 %1228  ;;  %v1345_v37 = vrot.slane %v1344_v2, 4  ;;  %v1312_v11 = vrot.slane %v1311_v29, 2  ;;  %v1301_v56 = vadd.f32 %v1300_v13, %v1299_v15 }
 0x503   :  { %v2061_v27 = vmul.f32 %v1967_v5, %v3392_v25  ;;  %v1269_v57 = vmul.f32 %v1229_v26, %v3454_v44  ;;  %v1403_v51 = vsel %vm1097_vm3, %v1294_v0, %v1402_v40  ;;  %v1307_v24 = vrot.slane %v1306_v63, 1 }
 0x504   :  { %v2084_v10 = vadd.f32 %v2083_v46, %v2082_v35  ;;  %v1346_v47 = vadd.f32 %v1345_v37, %v1344_v2  ;;  %v2080_v23 = vrot.slane %v2079_v45, 1  ;;  %v1340_v61 = vrot.slane %v1339_v9, 2 }
 0x505   :  { %v2089_v41 = vsel %vm964_vm1, %v2061_v27, 0.0  ;;  %v1351_v58 = vsel %vm964_vm1, %v1269_v57, 0.0  ;;  %v1313_v49 = vadd.f32 %v1312_v11, %v1311_v29  ;;  %v3769_v52 = vadd.f32 %v1307_v24, %v1306_v63 }
 0x506   :  { %v2085_v55 = vrot.slane %v2084_v10, 2  ;;  %v1974_v32 = vpop.permute.xlu1 %1973  ;;  %v1236_v48 = vpop.permute.xlu0 %1235  ;;  %v2090_v4 = vrot.slane %v2089_v41, 4  ;;  %v1347_v3 = vrot.slane %v1346_v47, 2  ;;  %v3772_v6 = vsel %vm1099_vm4, %v1301_v56, %v1403_v51 }
 0x507   :  { %v2062_v44 = vmul.f32 %v1974_v32, %v3408_v39  ;;  %v1270_v30 = vmul.f32 %v1236_v48, %v3482_v1  ;;  %v1352_v59 = vrot.slane %v1351_v58, 4  ;;  %v2081_v39 = vadd.f32 %v2080_v23, %v2079_v45 }
 0x508   :  { %v2091_v25 = vadd.f32 %v2090_v4, %v2089_v41  ;;  %v2086_v43 = vadd.f32 %v2085_v55, %v2084_v10  ;;  %v1341_v54 = vadd.f32 %v1340_v61, %v1339_v9  ;;  %v1314_v35 = vrot.slane %v1313_v49, 1 }
 0x509   :  { %v2096_v22 = vsel %vm964_vm1, %v2062_v44, 0.0  ;;  %v1358_v46 = vsel %vm964_vm1, %v1270_v30, 0.0  ;;  %v1348_v26 = vadd.f32 %v1347_v3, %v1346_v47  ;;  %v1353_v0 = vadd.f32 %v1352_v59, %v1351_v58 }
 0x50a   :  { %v1981_v7 = vpop.permute.xlu1 %1980  ;;  %v2016_v50 = vpop.permute.xlu0 %2015  ;;  %v2092_v21 = vrot.slane %v2091_v25, 2  ;;  %v2097_v33 = vrot.slane %v2096_v22, 4  ;;  %v2087_v5 = vrot.slane %v2086_v43, 1  ;;  %v1342_v37 = vrot.slane %v1341_v54, 1 }
 0x50b   :  { %v2063_v15 = vmul.f32 %v1981_v7, %v3488_v38  ;;  %v2068_v1 = vmul.f32 %v2016_v50, %v3515_v19  ;;  %v1359_v27 = vrot.slane %v1358_v46, 4  ;;  %v3781_v40 = vadd.f32 %v1314_v35, %v1313_v49 }
 0x50c   :  { %v2093_v36 = vadd.f32 %v2092_v21, %v2091_v25  ;;  %v2098_v29 = vadd.f32 %v2097_v33, %v2096_v22  ;;  %v2088_v47 = vadd.f32 %v2087_v5, %v2086_v43  ;;  %v1349_v51 = vrot.slane %v1348_v26, 1 }
 0x50d   :  { %v2103_v62 = vsel %vm964_vm1, %v2063_v15, 0.0  ;;  %v2138_v13 = vsel %vm964_vm1, %v2068_v1, 0.0  ;;  %v1354_v24 = vrot.slane %v1353_v0, 2  ;;  %v3785_v44 = vadd.f32 %v1342_v37, %v1341_v54 }
 0x50e   :  { %v1988_v2 = vpop.permute.xlu1 %1987  ;;  %v2023_v38 = vpop.permute.xlu0 %2022  ;;  %v2104_v18 = vrot.slane %v2103_v62, 4  ;;  %v2099_v63 = vrot.slane %v2098_v29, 2  ;;  %v2139_v45 = vrot.slane %v2138_v13, 4  ;;  %v2094_v57 = vrot.slane %v2093_v36, 1 }
 0x50f   :  { %v2064_v10 = vmul.f32 %v1988_v2, %v3522_v31  ;;  %v2069_v9 = vmul.f32 %v2023_v38, %v3473_v20  ;;  %v1360_v20 = vadd.f32 %v1359_v27, %v1358_v46  ;;  %v2203_v3 = vsel %vm1095_vm2, %v2088_v47, %v2081_v39 }
 0x510   :  { %v2105_v19 = vadd.f32 %v2104_v18, %v2103_v62  ;;  %v2100_v11 = vadd.f32 %v2099_v63, %v2098_v29  ;;  %v2140_v55 = vadd.f32 %v2139_v45, %v2138_v13  ;;  %v2095_v30 = vadd.f32 %v2094_v57, %v2093_v36 }
 0x511   :  { %v2110_v41 = vsel %vm964_vm1, %v2064_v10, 0.0  ;;  %v2145_v31 = vsel %vm964_vm1, %v2069_v9, 0.0  ;;  %v3790_v59 = vadd.f32 %v1349_v51, %v1348_v26  ;;  %v1361_v1 = vrot.slane %v1360_v20, 2 }
 0x512   :  { %v1995_v32 = vpop.permute.xlu1 %1994  ;;  %v2030_v48 = vpop.permute.xlu0 %2029  ;;  %v2106_v4 = vrot.slane %v2105_v19, 2  ;;  %v2111_v56 = vrot.slane %v2110_v41, 4  ;;  %v2101_v61 = vrot.slane %v2100_v11, 1  ;;  %v2141_v25 = vrot.slane %v2140_v55, 2 }
 0x513   :  { %v2065_v23 = vmul.f32 %v1995_v32, %v3467_v60  ;;  %v2070_v49 = vmul.f32 %v2030_v48, %v3501_v42  ;;  %v2146_v15 = vrot.slane %v2145_v31, 4  ;;  %v3792_v60 = vadd.f32 %v1354_v24, %v1353_v0 }
 0x514   :  { %v2112_v58 = vadd.f32 %v2111_v56, %v2110_v41  ;;  %v2107_v21 = vadd.f32 %v2106_v4, %v2105_v19  ;;  %v2102_v62 = vadd.f32 %v2101_v61, %v2100_v11  ;;  %v2142_v35 = vadd.f32 %v2141_v25, %v2140_v55 }
 0x515   :  { %v2117_v7 = vsel %vm964_vm1, %v2065_v23, 0.0  ;;  %v2152_v54 = vsel %vm964_vm1, %v2070_v49, 0.0  ;;  %v2204_v42 = vsel %vm1097_vm3, %v2095_v30, %v2203_v3  ;;  %v2147_v18 = vadd.f32 %v2146_v15, %v2145_v31 }
 0x516   :  { %v2002_v43 = vpop.permute.xlu1 %2001  ;;  %v2037_v50 = vpop.permute.xlu0 %2036  ;;  %v2113_v22 = vrot.slane %v2112_v58, 2  ;;  %v2118_v33 = vrot.slane %v2117_v7, 4  ;;  %v2153_v36 = vrot.slane %v2152_v54, 4  ;;  %v2108_v5 = vrot.slane %v2107_v21, 1 }
 0x517   :  { %v2066_v46 = vmul.f32 %v2002_v43, %v3508_v34  ;;  %v2071_v39 = vmul.f32 %v2037_v50, %v3534_v53  ;;  %v2205_v37 = vsel %vm1099_vm4, %v2102_v62, %v2204_v42  ;;  %v3802_v27 = vadd.f32 %v1361_v1, %v1360_v20 }
 0x518   :  { %v2119_v29 = vadd.f32 %v2118_v33, %v2117_v7  ;;  %v2114_v26 = vadd.f32 %v2113_v22, %v2112_v58  ;;  %v2154_v13 = vadd.f32 %v2153_v36, %v2152_v54  ;;  %v2143_v34 = vrot.slane %v2142_v35, 1 }
 0x519   :  { %v2124_v63 = vsel %vm964_vm1, %v2066_v46, 0.0  ;;  %v2159_v45 = vsel %vm964_vm1, %v2071_v39, 0.0  ;;  %v2109_v32 = vadd.f32 %v2108_v5, %v2107_v21  ;;  %v2148_v47 = vrot.slane %v2147_v18, 2  ;;  %v3921_v5 = vld [vmem:[#allocation16_spill] sm:$0xff] }
 0x51a   :  { %v1208_v2 = vpop.permute.xlu1 %1207  ;;  %v2044_v38 = vpop.permute.xlu0 %2043  ;;  %v2120_v0 = vrot.slane %v2119_v29, 2  ;;  %v2125_v19 = vrot.slane %v2124_v63, 4  ;;  %v2160_v9 = vrot.slane %v2159_v45, 4  ;;  %v2115_v48 = vrot.slane %v2114_v26, 1 }
 0x51b   :  { %v1266_v10 = vmul.f32 %v1208_v2, %v3447_v28  ;;  %v2072_v11 = vmul.f32 %v2044_v38, %v3551_v16  ;;  %v2155_v56 = vrot.slane %v2154_v13, 2  ;;  %v3807_v31 = vadd.f32 %v2143_v34, %v2142_v35 }
 0x51c   :  { %v2121_v53 = vadd.f32 %v2120_v0, %v2119_v29  ;;  %v2126_v4 = vadd.f32 %v2125_v19, %v2124_v63  ;;  %v2161_v28 = vadd.f32 %v2160_v9, %v2159_v45  ;;  %v2149_v49 = vadd.f32 %v2148_v47, %v2147_v18 }
 0x51d   :  { %v1330_v57 = vsel %vm964_vm1, %v1266_v10, 0.0  ;;  %v2166_v24 = vsel %vm964_vm1, %v2072_v11, 0.0  ;;  %v2116_v22 = vadd.f32 %v2115_v48, %v2114_v26  ;;  %v2156_v15 = vadd.f32 %v2155_v56, %v2154_v13  ;;  %v3922_v48 = vld [vmem:[#allocation15_spill] sm:$0xff] }
 0x51e   :  { %v2009_v55 = vpop.permute.xlu1 %2008  ;;  %v2051_v41 = vpop.permute.xlu0 %2050  ;;  %v1331_v51 = vrot.slane %v1330_v57, 4  ;;  %v2127_v23 = vrot.slane %v2126_v4, 2  ;;  %v2167_v61 = vrot.slane %v2166_v24, 4  ;;  %v2122_v25 = vrot.slane %v2121_v53, 1 }
 0x51f   :  { %v2067_v20 = vmul.f32 %v2009_v55, %v3494_v12  ;;  %v2162_v58 = vrot.slane %v2161_v28, 2  ;;  %v2073_v30 = vmul.f32 %v2051_v41, %v3525_v14  ;;  %v2206_v39 = vsel %vm1101_vm5, %v2109_v32, %v2205_v37 }
 0x520   :  { %v1332_v16 = vadd.f32 %v1331_v51, %v1330_v57  ;;  %v2128_v43 = vadd.f32 %v2127_v23, %v2126_v4  ;;  %v2168_v50 = vadd.f32 %v2167_v61, %v2166_v24  ;;  %v2123_v36 = vadd.f32 %v2122_v25, %v2121_v53  ;;  %v3923_v51 = vld [vmem:[#allocation17_spill] sm:$0xff] }
 0x521   :  { %v2131_v3 = vsel %vm964_vm1, %v2067_v20, 0.0  ;;  %v2173_v12 = vsel %vm964_vm1, %v2073_v30, 0.0  ;;  %v2163_v42 = vadd.f32 %v2162_v58, %v2161_v28  ;;  %v2150_v2 = vrot.slane %v2149_v49, 1 }
 0x522   :  { %v1194_v7 = vpop.permute.xlu1 %1193  ;;  %v1243_v21 = vpop.permute.xlu0 %1242  ;;  %v1333_v33 = vrot.slane %v1332_v16, 2  ;;  %v2132_v54 = vrot.slane %v2131_v3, 4  ;;  %v2129_v62 = vrot.slane %v2128_v43, 1  ;;  %v2169_v1 = vrot.slane %v2168_v50, 2 }
 0x523   :  { %v1264_v35 = vmul.f32 %v1194_v7, %v3541_v17  ;;  %v2174_v29 = vrot.slane %v2173_v12, 4  ;;  %v1271_v26 = vmul.f32 %v1243_v21, %v3921_v5  ;;  %v2207_v18 = vsel %vm1103_vm7, %v2116_v22, %v2206_v39  ;;  %v3925_v39 = vld [vmem:[#allocation19_spill] sm:$0xff] }
 0x524   :  { %v2133_v14 = vadd.f32 %v2132_v54, %v2131_v3  ;;  %v2130_v13 = vadd.f32 %v2129_v62, %v2128_v43  ;;  %v1334_v45 = vadd.f32 %v1333_v33, %v1332_v16  ;;  %v2170_v10 = vadd.f32 %v2169_v1, %v2168_v50  ;;  %v3824_v43 = vld [vmem:[#allocation2] sm:$0xff] }
 0x525   :  { %v1316_v38 = vsel %vm964_vm1, %v1264_v35, 0.0  ;;  %v2175_v63 = vadd.f32 %v2174_v29, %v2173_v12  ;;  %v1365_v34 = vsel %vm964_vm1, %v1271_v26, 0.0  ;;  %v2208_v53 = vsel %vm1105_vm6, %v2123_v36, %v2207_v18  ;;  %v3924_v36 = vld [vmem:[#allocation18_spill] sm:$0xff] }
 0x526   :  { %v2058_v46 = vpop.permute.xlu1 %2057  ;;  %v2134_v0 = vrot.slane %v2133_v14, 2  ;;  %v1317_v17 = vrot.slane %v1316_v38, 4  ;;  %v1250_v19 = vpop.permute.xlu0 %1249  ;;  %v2157_v9 = vrot.slane %v2156_v15, 1  ;;  %v2164_v37 = vrot.slane %v2163_v42, 1 }
 0x527   :  { %v2176_v55 = vrot.slane %v2175_v63, 2  ;;  %v1366_v32 = vrot.slane %v1365_v34, 4  ;;  %v2074_v47 = vmul.f32 %v2058_v46, %v3922_v48  ;;  %v2151_v4 = vadd.f32 %v2150_v2, %v2149_v49 }
 0x528   :  { %v2135_v57 = vadd.f32 %v2134_v0, %v2133_v14  ;;  %v1318_v41 = vadd.f32 %v1317_v17, %v1316_v38  ;;  %v2209_v56 = vsel %vm1107_vm8, %v2130_v13, %v2208_v53  ;;  %v1272_v24 = vmul.f32 %v1250_v19, %v3923_v51 }
 0x529   :  { %v1335_v23 = vrot.slane %v1334_v45, 1  ;;  %v2171_v61 = vrot.slane %v2170_v10, 1  ;;  %v1367_v20 = vadd.f32 %v1366_v32, %v1365_v34  ;;  %v2180_v25 = vsel %vm964_vm1, %v2074_v47, 0.0 }
 0x52a   :  { %v1201_v11 = vpop.permute.xlu1 %1200  ;;  %v2136_v28 = vrot.slane %v2135_v57, 1  ;;  %v2158_v58 = vadd.f32 %v2157_v9, %v2156_v15  ;;  %v2165_v16 = vadd.f32 %v2164_v37, %v2163_v42  ;;  %v2181_v7 = vrot.slane %v2180_v25, 4 }
 0x52b   :  { %v3827_v50 = vadd.f32 %v3824_v43, %v2209_v56  ;;  %v2177_v49 = vadd.f32 %v2176_v55, %v2175_v63  ;;  %v1319_v3 = vrot.slane %v1318_v41, 2  ;;  %v1372_v21 = vsel %vm964_vm1, %v1272_v24, 0.0 }
 0x52c   :  { %v2137_v30 = vadd.f32 %v2136_v28, %v2135_v57  ;;  %v1368_v54 = vrot.slane %v1367_v20, 2  ;;  %v2182_v62 = vadd.f32 %v2181_v7, %v2180_v25  ;;  %v1373_v1 = vrot.slane %v1372_v21, 4 }
 0x52d   :  { %v1336_v15 = vadd.f32 %v1335_v23, %v1334_v45  ;;  %v2172_v12 = vadd.f32 %v2171_v61, %v2170_v10  ;;  %v1265_v42 = vmul.f32 %v1201_v11, %v3924_v36  ;;  %v2178_v5 = vrot.slane %v2177_v49, 1 }
 0x52e   :  { %v1257_v22 = vpop.permute.xlu1 %1256  ;;  %v2210_v33 = vsel %vm1095_vm2, %v3807_v31, %v2137_v30  ;;  %v2183_v29 = vrot.slane %v2182_v62, 2  ;;  %v1374_v46 = vadd.f32 %v1373_v1, %v1372_v21  ;;  %v1320_v26 = vadd.f32 %v1319_v3, %v1318_v41 }
 0x52f   :  { %v2211_v35 = vsel %vm1097_vm3, %v2151_v4, %v2210_v33  ;;  %v1273_v2 = vmul.f32 %v1257_v22, %v3925_v39  ;;  %v1323_v31 = vsel %vm964_vm1, %v1265_v42, 0.0  ;;  %v1369_v18 = vadd.f32 %v1368_v54, %v1367_v20 }
 0x530   :  { %v2212_v14 = vsel %vm1099_vm4, %v2158_v58, %v2211_v35  ;;  %v2184_v13 = vadd.f32 %v2183_v29, %v2182_v62  ;;  %v1375_v0 = vrot.slane %v1374_v46, 2  ;;  %v1324_v63 = vrot.slane %v1323_v31, 4 }
 0x531   :  { %v2213_v38 = vsel %vm1101_vm5, %v2165_v16, %v2212_v14  ;;  %v1356_v45 = vrot.slane %v3792_v60, 1  ;;  %v1409_v10 = vsel %vm1095_vm2, %v3785_v44, %v1336_v15  ;;  %v1379_v34 = vsel %vm964_vm1, %v1273_v2, 0.0  ;;  %v3854_v16 = vld [vmem:[#allocation2 + $0x8] sm:$0xff] }
 0x532   :  { %v2214_v17 = vsel %vm1103_vm7, %v2172_v12, %v2213_v38  ;;  %v2185_v19 = vrot.slane %v2184_v13, 1  ;;  %v1376_v53 = vadd.f32 %v1375_v0, %v1374_v46  ;;  %v1325_v9 = vadd.f32 %v1324_v63, %v1323_v31 }
 0x533   :  { %v1380_v37 = vrot.slane %v1379_v34, 4  ;;  %v1363_v57 = vrot.slane %v3802_v27, 1  ;;  %v2179_v11 = vadd.f32 %v2178_v5, %v2177_v49  ;;  %v1321_v55 = vrot.slane %v1320_v26, 1 }
 0x534   :  { %v2223_v41 = vmul.f32 0.044715, %v3827_v50  ;;  %v1370_v32 = vrot.slane %v1369_v18, 1  ;;  %v2186_v48 = vadd.f32 %v2185_v19, %v2184_v13  ;;  %v1326_v47 = vrot.slane %v1325_v9, 2 }
 0x535   :  { %v1381_v4 = vadd.f32 %v1380_v37, %v1379_v34  ;;  %v1410_v44 = vsel %vm1097_vm3, %v3790_v59, %v1409_v10  ;;  %v2215_v56 = vsel %vm1105_vm6, %v2179_v11, %v2214_v17  ;;  %v1377_v28 = vrot.slane %v1376_v53, 1  ;;  %v129_v11 = vld [vmem:[#allocation8 + $0x18] sm:$0xff] }
 0x536   :  { %v2225_v51 = vmul.f32 %v2223_v41, %v3827_v50  ;;  %v1357_v24 = vadd.f32 %v1356_v45, %v3792_v60  ;;  %v2216_v23 = vsel %vm1107_vm8, %v2186_v48, %v2215_v56  ;;  %v1327_v61 = vadd.f32 %v1326_v47, %v1325_v9 }
 0x537   :  { %v1382_v20 = vrot.slane %v1381_v4, 2  ;;  %v1405_v25 = vsel %vm1101_vm5, %v3769_v52, %v3772_v6  ;;  %v1322_v58 = vadd.f32 %v1321_v55, %v1320_v26  ;;  %v2220_v59 = vadd.f32 %v3854_v16, %v2216_v23  ;;  %v2474_v23 = vld [vmem:[%s3909_s10] ss:$0 sm:$0xff]  ;;  %s2858_s10 = smov [#allocation10]  }
 0x538   :  { %v2227_v30 = vmul.f32 %v2225_v51, %v3827_v50  ;;  %v1411_v7 = vsel %vm1099_vm4, %v1357_v24, %v1410_v44  ;;  %v1371_v49 = vadd.f32 %v1370_v32, %v1369_v18  ;;  %v1328_v3 = vrot.slane %v1327_v61, 1  ;;  %s2436_s19 = sshll.u32 %s2858_s10, 4  ;;  %s2437_s19 = int_to_ptr.vmem [resolvable:$true] %s2436_s19 }
 0x539   :  { %v1383_v60 = vadd.f32 %v1382_v20, %v1381_v4  ;;  %v1364_v21 = vadd.f32 %v1363_v57, %v3802_v27  ;;  %v2224_v22 = vmul.f32 0.044715, %v2220_v59  ;;  %v1378_v33 = vadd.f32 %v1377_v28, %v1376_v53  ;;  %v128_v57 = vld [vmem:[#allocation8 + $0x10] sm:$0xff]  ;;  %s2818_s20 = scalar_lea.vmem %s2437_s19, 256  ;;  %p2823_p5 = scmp.lt.s32.totalorder %s2437_s19, %s2437_s19 }
 0x53a   :  { %v2229_v54 = vadd.f32 %v2227_v30, %v3827_v50  ;;  %v1406_v52 = vsel %vm1103_vm7, %v3781_v40, %v1405_v25  ;;  %v1329_v6 = vadd.f32 %v1328_v3, %v1327_v61  ;;  %v2221_v34 = vmul.f32 0.5, %v3827_v50  ;;  %p2819_p4 = scmp.ne.s32.totalorder %s2437_s19, %s2818_s20  ;;  %p2824_p6 = scmp.lt.s32.totalorder %s2818_s20, %s2818_s20 }
 0x53b   :  { %v1384_v62 = vrot.slane %v1383_v60, 1  ;;  %v1407_v1 = vsel %vm1105_vm6, %v1322_v58, %v1406_v52  ;;  %v1412_v15 = vsel %vm1101_vm5, %v1364_v21, %v1411_v7  ;;  %v2226_v12 = vmul.f32 %v2224_v22, %v2220_v59 }
 0x53c   :  { %v2231_v35 = vmul.f32 0.7978846, %v2229_v54  ;;  %v1413_v36 = vsel %vm1103_vm7, %v1371_v49, %v1412_v15  ;;  %v1408_v42 = vsel %vm1107_vm8, %v1329_v6, %v1407_v1  ;;  %v2222_v55 = vmul.f32 0.5, %v2220_v59  ;;  %p2825_p7 = por %p2824_p6, %p2823_p5 }
 0x53d   :  { %v1385_v27 = vadd.f32 %v1384_v62, %v1383_v60  ;;  %v1414_v14 = vsel %vm1105_vm6, %v1378_v33, %v1413_v36  ;;  %v1418_v29 = vadd.f32 %v3824_v43, %v1408_v42  ;;  %v2228_v46 = vmul.f32 %v2226_v12, %v2220_v59 }
 0x53e   :  { %2716 = vtanh.f32 %v2231_v35  ;;  %v2651_v48 = vpack.c.bf16 %v129_v11, %v128_v57  ;;  %p2826_p8 = pnand %p2825_p7, %p2819_p4 }
 0x53f   :  { %v1415_v40 = vsel %vm1107_vm8, %v1385_v27, %v1414_v14  ;;  %v2230_v2 = vadd.f32 %v2228_v46, %v2220_v59  ;;  %v1422_v38 = vmul.f32 0.044715, %v1418_v29  ;;  %v1420_v50 = vmul.f32 0.5, %v1418_v29 }
 0x540   :  { %v1419_v39 = vadd.f32 %v3854_v16, %v1415_v40 }
 0x541   :  { %v2232_v5 = vmul.f32 0.7978846, %v2230_v2  ;;  %v1424_v26 = vmul.f32 %v1422_v38, %v1418_v29 }
 0x542   :  { %v1423_v31 = vmul.f32 0.044715, %v1419_v39  ;;  %v1421_v28 = vmul.f32 0.5, %v1419_v39 }
 0x543   :  { %2718 = vtanh.f32 %v2232_v5  ;;  %v1426_v18 = vmul.f32 %v1424_v26, %v1418_v29 }
 0x544   :  { %v1425_v13 = vmul.f32 %v1423_v31, %v1419_v39 }
 0x545   :  { %v1428_v0 = vadd.f32 %v1426_v18, %v1418_v29 }
 0x546   :  { %v1427_v63 = vmul.f32 %v1425_v13, %v1419_v39 }
 0x547   :  { %v1430_v10 = vmul.f32 0.7978846, %v1428_v0 }
 0x548   :  { %v2717_v45 = vpop.eup %2716  ;;  %v1429_v17 = vadd.f32 %v1427_v63, %v1419_v39 }
 0x549   :  { %v2235_v19 = vadd.f32 1.0, %v2717_v45  ;;  %2720 = vtanh.f32 %v1430_v10 }
 0x54a   :  { %v1431_v53 = vmul.f32 0.7978846, %v1429_v17 }
 0x54b   :  { %v2237_v9 = vmul.f32 %v2235_v19, %v2221_v34 }
 0x54c   :  { %2722 = vtanh.f32 %v1431_v53 }
 0x54d   :  { %2593 = vmatprep.mubr.msk.f32.mxu1 %vm136_vm0, %v2237_v9  ;;  %v2719_v37 = vpop.eup %2718 }
 0x54e   :  { %v2236_v41 = vadd.f32 1.0, %v2719_v37 }
 0x550   :  { %v2238_v32 = vmul.f32 %v2236_v41, %v2222_v55 }
 0x552   :  { %2594 = vmatmul.mubr.msk.f32.vlgmr.msra.gmra.mrb[8].mxu1 %vm136_vm0, %v2238_v32 }
 0x553   :  { %v2721_v47 = vpop.eup %2720  ;;  %2650 = vmatpush3.bf16.msra.mxu1 %v3736_v8 }
 0x554   :  { %2652 = vmatprep.subr.bf16.mxu1 %v2651_v48  ;;  %v1434_v4 = vadd.f32 1.0, %v2721_v47 }
 0x556   :  { %v2723_v44 = vpop.eup %2722  ;;  %v1436_v56 = vmul.f32 %v1434_v4, %v1420_v50 }
 0x557   :  { %v1435_v51 = vadd.f32 1.0, %v2723_v44  ;;  %2654 = vmatpush3.bf16.msra.mxu1 %v2651_v48 }
 0x558   :  { %2604 = vmatprep.mubr.msk.f32.mxu1 %vm136_vm0, %v1436_v56 }
 0x559   :  { %v1437_v24 = vmul.f32 %v1435_v51, %v1421_v28 }
 0x55b   :  { %2605 = vmatmul.mubr.msk.f32.vlgmr.msra.gmra.mrb[8].mxu1 %vm136_vm0, %v1437_v24 }
 0x62e   :  { %v2606_v61 = vpop.f32.mrb[8].mxu1 }
 0x62f   :  { %v2408_v20 = vadd.f32 %v2606_v61, %v2474_v23  ;;  %v2392_v8 = vpop.f32.mrb[9].mxu1 }
 0x630   :  { %v2407_v25 = vadd.f32 %v2474_v23, %v2392_v8 }
 0x631   :  { %v2412_v58 = vmul.f32 0.044715, %v2408_v20  ;;  %v2410_v6 = vmul.f32 0.5, %v2408_v20 }
 0x632   :  { %v2411_v59 = vmul.f32 0.044715, %v2407_v25  ;;  %v2409_v1 = vmul.f32 0.5, %v2407_v25 }
 0x633   :  { %v2414_v30 = vmul.f32 %v2412_v58, %v2408_v20 }
 0x634   :  { %v2413_v7 = vmul.f32 %v2411_v59, %v2407_v25 }
 0x635   :  { %v2416_v49 = vmul.f32 %v2414_v30, %v2408_v20 }
 0x636   :  { %v2415_v3 = vmul.f32 %v2413_v7, %v2407_v25 }
 0x637   :  { %v2418_v60 = vadd.f32 %v2416_v49, %v2408_v20 }
 0x638   :  { %v2417_v21 = vadd.f32 %v2415_v3, %v2407_v25 }
 0x639   :  { %v2420_v22 = vmul.f32 0.7978846, %v2418_v60 }
 0x63a   :  { %v2419_v33 = vmul.f32 0.7978846, %v2417_v21 }
 0x63b   :  { %2724 = vtanh.f32 %v2420_v22 }
 0x63c   :  { %2726 = vtanh.f32 %v2419_v33 }
 0x645   :  { %v2725_v54 = vpop.eup %2724 }
 0x646   :  { %v2727_v52 = vpop.eup %2726  ;;  %v2424_v62 = vadd.f32 1.0, %v2725_v54 }
 0x647   :  { %v2423_v15 = vadd.f32 1.0, %v2727_v52 }
 0x648   :  { %v2426_v12 = vmul.f32 %v2424_v62, %v2410_v6 }
 0x649   :  { %v2425_v35 = vmul.f32 %v2423_v15, %v2409_v1 }
 0x64a   :  { %v2428_v36 = vadd.f32 %v3854_v16, %v2426_v12 }
 0x64b   :  { %v2427_v42 = vadd.f32 %v3824_v43, %v2425_v35 }
 0x64c   :  { %2430 = vst.msk [vmem:[#allocation10 + $0x8] sm:$0xff] %vm136_vm0, %v2428_v36 }
 0x64d   :  { %2429 = vst.msk [vmem:[#allocation10] sm:$0xff] %vm136_vm0, %v2427_v42 }
 0x64e   :  { %2829 = shalt.err (!%p2826_p8)
}
 0x64f   :  { %s2830_s23 = scalar_lea.hbm %s3910_s11, 256 }
 0x650   :  { %p2831_p9 = scmp.ne.s32.totalorder %s3910_s11, %s2830_s23  ;;  %p2834_p10 = scmp.lt.u32.totalorder %s2830_s23, %s3910_s11 }
 0x652   :  { %p2836_p11 = pnand %p2834_p10, %p2831_p9 }
 0x654   :  { %2839 = shalt.err (!%p2836_p11)
}
 0x655   :  { %2442 = dma.vmem_to_hbm [thread:$0]  %s2437_s19, 256, %s3910_s11, [#allocation4], %s2852_s1, %s2852_s1, %s2853_s18  }
 0x656   :  { %2846 = dma.done.wait [#allocation4], 256  }
 0x657   :  { %2847 = vsyncadd [#allocation4], 4294967040 }
 0x658   :  { %2446 = vsyncpa [#allocation3], 1 }
 0x659   :  { %2447 = vsyncpa [#allocation6], 1 }
 0x65a   :  { %2448 = vsyncpa [#allocation9], 1 }
 0x65b   :  { %2449 = vsyncpa [#allocation4], 1 }

</bundles_post_ra>
